<compile_context>
chip_gen: v7x
topology: tpu7x:2x2x1
jax: 0.10.0
libtpu: 0.0.40
codegen_flags: <defaults>
</compile_context>

<pallas_src>
import jax
import jax.numpy as jnp
from jax.experimental import pallas as pl
from jax.experimental.pallas import tpu as pltpu

_LANE = 128
_SUBLANE = 8


def _round_up(x, m):
    return (x + m - 1) // m * m


def _mlp_kernel(x_ref, w1_ref, b1_ref, w2_ref, b2_ref, out_ref):
    # x_ref:  (TM, D)  f32 node-feature tile (streamed; cast to bf16 in-kernel)
    # w1_ref: (D, H)   bf16, resident (constant index_map)
    # b1_ref: (1, H)   f32
    # w2_ref: (H, C)   bf16, resident
    # b2_ref: (1, C)   f32
    # out_ref:(TM, C)  bf16 (unpadded, masked stores; C*2 B/row writeback)
    x = x_ref[...].astype(jnp.bfloat16)
    h = jnp.dot(x, w1_ref[...], preferred_element_type=jnp.float32)
    h = jnp.maximum(h + b1_ref[...], 0.0)                      # bias + ReLU on VPU
    o = jnp.dot(h.astype(jnp.bfloat16), w2_ref[...],
                preferred_element_type=jnp.float32)
    out_ref[...] = (o + b2_ref[...]).astype(out_ref.dtype)


def net_forward(features, w1, b1, w2, b2, *, tile_m=None, out_dtype=jnp.bfloat16):
    """Fused MLP backbone forward: relu(x@W1+b1)@W2+b2, tiled over nodes."""
    N, D = features.shape
    H = w1.shape[1]
    C = w2.shape[1]

    # Weights/biases are tiny: a one-time cast is negligible HBM traffic.
    w1b = w1.astype(jnp.bfloat16)
    w2b = w2.astype(jnp.bfloat16)
    b1f = b1.astype(jnp.float32).reshape(1, H)
    b2f = b2.astype(jnp.float32).reshape(1, C)

    # Node tile: single step for small N; >=16 steps for large N so each v7x
    # TensorCore gets several pipelined iterations with the "parallel" axis.
    n_pad = _round_up(N, _SUBLANE)
    if tile_m is None:
        if n_pad <= 2048:
            tile_m = n_pad
        else:
            tile_m = min(4096, _round_up(pl.cdiv(N, 16), _SUBLANE))
    tile_m = max(_SUBLANE, min(_round_up(tile_m, _SUBLANE), n_pad))
    grid = (pl.cdiv(N, tile_m),)

    # Explicit VMEM budget (already includes the 2x double-buffer factor) so
    # large tiles don't trip v5e's 16 MiB default scoped limit; capped at
    # 32 MiB to leave headroom on v7x's 64 MiB physical VMEM.
    def _tile_bytes(r, c, itemsize):
        return _round_up(r, _SUBLANE) * _round_up(c, _LANE) * itemsize

    out_itemsize = jnp.dtype(out_dtype).itemsize
    vmem_bytes = (
        2 * _tile_bytes(tile_m, D, 4)                           # x tiles (f32)
        + 2 * _tile_bytes(tile_m, C, out_itemsize)              # out tiles
        + 2 * (_tile_bytes(D, H, 2) + _tile_bytes(H, C, 2))     # weights (bf16)
        + 2 * (_tile_bytes(1, H, 4) + _tile_bytes(1, C, 4))     # biases (f32)
    )
    vmem_limit = int(min(max(vmem_bytes + (2 << 20), 8 << 20), 32 << 20))

    cost = pl.CostEstimate(
        flops=2 * N * (D * H + H * C),
        transcendentals=0,
        bytes_accessed=(N * D * 4 + N * C * out_itemsize
                        + D * H * 2 + H * C * 2 + (H + C) * 4),
    )

    out = pl.pallas_call(
        _mlp_kernel,
        out_shape=jax.ShapeDtypeStruct((N, C), out_dtype),
        grid_spec=pltpu.PrefetchScalarGridSpec(
            num_scalar_prefetch=0,
            grid=grid,
            in_specs=[
                pl.BlockSpec((tile_m, D), lambda i: (i, 0)),   # features tile
                pl.BlockSpec((D, H), lambda i: (0, 0)),        # W1 (resident)
                pl.BlockSpec((1, H), lambda i: (0, 0)),        # b1
                pl.BlockSpec((H, C), lambda i: (0, 0)),        # W2 (resident)
                pl.BlockSpec((1, C), lambda i: (0, 0)),        # b2
            ],
            out_specs=pl.BlockSpec((tile_m, C), lambda i: (i, 0)),
        ),
        compiler_params=pltpu.CompilerParams(
            dimension_semantics=("parallel",),
            vmem_limit_bytes=vmem_limit,
        ),
        cost_estimate=cost,
    )(features.astype(jnp.float32), w1b, b1f, w2b, b2f)

    return out


def _reference(features, w1, b1, w2, b2, out_dtype=jnp.bfloat16):
    # Same precision recipe as the kernel (bf16 operands, f32 accumulation,
    # final cast to the kernel's output dtype).
    x = features.astype(jnp.bfloat16)
    h = jnp.dot(x, w1.astype(jnp.bfloat16), preferred_element_type=jnp.float32)
    h = jnp.maximum(h + b1.astype(jnp.float32).reshape(1, -1), 0.0)
    o = jnp.dot(h.astype(jnp.bfloat16), w2.astype(jnp.bfloat16),
                preferred_element_type=jnp.float32)
    return (o + b2.astype(jnp.float32).reshape(1, -1)).astype(out_dtype)


if __name__ == "__main__":
    # Node-classification forward pass: N nodes, D input dim, H hidden, C classes.
    # N=1024 -> a single grid step (overhead-dominated regime at this size).
    N, D, H, C = 1024, 32, 64, 16

    key = jax.random.PRNGKey(0)
    k_x, k_w1, k_b1, k_w2, k_b2 = jax.random.split(key, 5)

    features = jax.random.normal(k_x, (N, D), dtype=jnp.float32)
    w1 = jax.random.normal(k_w1, (D, H), dtype=jnp.float32) * (1.0 / jnp.sqrt(D))
    b1 = jax.random.normal(k_b1, (1, H), dtype=jnp.float32) * 0.01
    w2 = jax.random.normal(k_w2, (H, C), dtype=jnp.float32) * (1.0 / jnp.sqrt(H))
    b2 = jax.random.normal(k_b2, (1, C), dtype=jnp.float32) * 0.01

    out = net_forward(features, w1, b1, w2, b2)
    out = jax.block_until_ready(out)

    ref = _reference(features, w1, b1, w2, b2)
    assert out.shape == (N, C)
    assert out.dtype == jnp.bfloat16
    assert jnp.allclose(out.astype(jnp.float32), ref.astype(jnp.float32),
                        atol=2e-2, rtol=2e-2), "mismatch vs reference"

    print("KERNEL_OK")
</pallas_src>

<mosaic_0001>
module attributes {stable_mosaic.version = 11 : i64} {
  func.func @_mlp_kernel(%arg0: i32, %arg1: memref<1024x32xf32, #tpu.memory_space<vmem>>, %arg2: memref<32x64xbf16, #tpu.memory_space<vmem>>, %arg3: memref<1x64xf32, #tpu.memory_space<vmem>>, %arg4: memref<64x16xbf16, #tpu.memory_space<vmem>>, %arg5: memref<1x16xf32, #tpu.memory_space<vmem>>, %arg6: memref<1024x16xbf16, #tpu.memory_space<vmem>>) attributes {dimension_semantics = [#tpu.dimension_semantics<parallel>], iteration_bounds = array<i64: 1>, scalar_prefetch = 0 : i64, scratch_operands = 0 : i64, tpu.core_type = #tpu.core_type<tc>, window_params = [{transform_indices = @transform_0, window_bounds = array<i64: 1024, 32>}, {pipeline_mode = #tpu.pipeline_mode<synchronous>, transform_indices = @transform_1, window_bounds = array<i64: 32, 64>}, {pipeline_mode = #tpu.pipeline_mode<synchronous>, transform_indices = @transform_2, window_bounds = array<i64: 1, 64>}, {pipeline_mode = #tpu.pipeline_mode<synchronous>, transform_indices = @transform_3, window_bounds = array<i64: 64, 16>}, {pipeline_mode = #tpu.pipeline_mode<synchronous>, transform_indices = @transform_4, window_bounds = array<i64: 1, 16>}, {transform_indices = @transform_5, window_bounds = array<i64: 1024, 16>}]} {
    %c0 = arith.constant 0 : index
    %c0_0 = arith.constant 0 : index
    %0 = vector.load %arg1[%c0, %c0_0] : memref<1024x32xf32, #tpu.memory_space<vmem>>, vector<1024x32xf32>
    %1 = arith.truncf %0 : vector<1024x32xf32> to vector<1024x32xbf16>
    %c0_1 = arith.constant 0 : index
    %c0_2 = arith.constant 0 : index
    %2 = vector.load %arg2[%c0_1, %c0_2] : memref<32x64xbf16, #tpu.memory_space<vmem>>, vector<32x64xbf16>
    %cst = arith.constant dense<0.000000e+00> : vector<1024x64xf32>
    %3 = tpu.matmul %1, %2, %cst {dimension_numbers = #tpu.dot_dimension_numbers<[1], [0], [0], [1], [0, 0, 1, 1], [], []>} : vector<1024x32xbf16>, vector<32x64xbf16>, vector<1024x64xf32> -> vector<1024x64xf32>
    %c0_3 = arith.constant 0 : index
    %c0_4 = arith.constant 0 : index
    %4 = vector.load %arg3[%c0_3, %c0_4] : memref<1x64xf32, #tpu.memory_space<vmem>>, vector<1x64xf32>
    %5 = vector.broadcast %4 : vector<1x64xf32> to vector<1024x64xf32>
    %6 = arith.addf %3, %5 : vector<1024x64xf32>
    %cst_5 = arith.constant 0.000000e+00 : f32
    %7 = vector.broadcast %cst_5 : f32 to vector<1024x64xf32>
    %8 = arith.maximumf %6, %7 : vector<1024x64xf32>
    %9 = arith.truncf %8 : vector<1024x64xf32> to vector<1024x64xbf16>
    %c0_6 = arith.constant 0 : index
    %c0_7 = arith.constant 0 : index
    %10 = vector.load %arg4[%c0_6, %c0_7] : memref<64x16xbf16, #tpu.memory_space<vmem>>, vector<64x16xbf16>
    %cst_8 = arith.constant dense<0.000000e+00> : vector<1024x16xf32>
    %11 = tpu.matmul %9, %10, %cst_8 {dimension_numbers = #tpu.dot_dimension_numbers<[1], [0], [0], [1], [0, 0, 1, 1], [], []>} : vector<1024x64xbf16>, vector<64x16xbf16>, vector<1024x16xf32> -> vector<1024x16xf32>
    %c0_9 = arith.constant 0 : index
    %c0_10 = arith.constant 0 : index
    %12 = vector.load %arg5[%c0_9, %c0_10] : memref<1x16xf32, #tpu.memory_space<vmem>>, vector<1x16xf32>
    %13 = vector.broadcast %12 : vector<1x16xf32> to vector<1024x16xf32>
    %14 = arith.addf %11, %13 : vector<1024x16xf32>
    %15 = arith.truncf %14 : vector<1024x16xf32> to vector<1024x16xbf16>
    %c0_11 = arith.constant 0 : index
    %c0_12 = arith.constant 0 : index
    %16 = vector.load %arg6[%c0_11, %c0_12] : memref<1024x16xbf16, #tpu.memory_space<vmem>>, vector<1024x16xbf16>
    tpu.vector_store %arg6[%c0_11, %c0_12], %15 {strides = array<i32>} : memref<1024x16xbf16, #tpu.memory_space<vmem>>, vector<1024x16xbf16>,
    return
  }
  func.func @transform_0(%arg0: i32) -> (i32, i32) {
    %c0_i32 = arith.constant 0 : i32
    %c0_i32_0 = arith.constant 0 : i32
    return %arg0, %c0_i32 : i32, i32
  }
  func.func @transform_1(%arg0: i32) -> (i32, i32) {
    %c0_i32 = arith.constant 0 : i32
    %c0_i32_0 = arith.constant 0 : i32
    %c0_i32_1 = arith.constant 0 : i32
    return %c0_i32, %c0_i32_0 : i32, i32
  }
  func.func @transform_2(%arg0: i32) -> (i32, i32) {
    %c0_i32 = arith.constant 0 : i32
    %c0_i32_0 = arith.constant 0 : i32
    %c0_i32_1 = arith.constant 0 : i32
    return %c0_i32, %c0_i32_0 : i32, i32
  }
  func.func @transform_3(%arg0: i32) -> (i32, i32) {
    %c0_i32 = arith.constant 0 : i32
    %c0_i32_0 = arith.constant 0 : i32
    %c0_i32_1 = arith.constant 0 : i32
    return %c0_i32, %c0_i32_0 : i32, i32
  }
  func.func @transform_4(%arg0: i32) -> (i32, i32) {
    %c0_i32 = arith.constant 0 : i32
    %c0_i32_0 = arith.constant 0 : i32
    %c0_i32_1 = arith.constant 0 : i32
    return %c0_i32, %c0_i32_0 : i32, i32
  }
  func.func @transform_5(%arg0: i32) -> (i32, i32) {
    %c0_i32 = arith.constant 0 : i32
    %c0_i32_0 = arith.constant 0 : i32
    return %arg0, %c0_i32 : i32, i32
  }
}

</mosaic_0001>

<bundles_post_ra>
// kernel: tpu_custom_call.1
= control target key start
LH: loop header
LB: loop body
LE: loop exit
PB: predicated region body
PF: predicated region fallthrough
CT: control target
= control target key end

     0   :  { %vm236_vm0 = vcmask 261120   ;;  %vm1205_vm1 = vcmask 523264   ;;  %vm2455_vm2 = vcmask 125952   ;;  %s4738_s1 = inlined_call_operand.vmem [shape: bf16[32,64], index: 1, kind: input, shape index: {}]   ;;  %s4739_s0 = inlined_call_operand.vmem [shape: f32[1024,32], index: 0, kind: input, shape index: {}]   ;;  %s4740_s3 = inlined_call_operand.vmem [shape: bf16[64,16], index: 3, kind: input, shape index: {}]   ;;  %s4741_s2 = inlined_call_operand.vmem [shape: f32[1,64], index: 2, kind: input, shape index: {}]   ;;  %s4742_s4 = inlined_call_operand.vmem [shape: f32[1,16], index: 4, kind: input, shape index: {}]   ;;  %s4743_s5 = inlined_call_operand.vmem [shape: bf16[1024,16], index: 5, kind: output, shape index: {}]  }
   0x1   :  { %v3382_v0 = vld [vmem:[%s4738_s1] sm:$0xff]   ;;  %v3383_v1 = vld [vmem:[%s4738_s1 + $0x8] sm:$0xff]   ;;  %v23_v5 = vld [vmem:[%s4739_s0 + $0x10] sm:$0xff] }
   0x2   :  { %3114 = vmatprep.subr.bf16.mxu0 %v3382_v0  ;;  %v21_v2 = vld [vmem:[%s4739_s0] sm:$0xff]  ;;  %v22_v3 = vld [vmem:[%s4739_s0 + $0x8] sm:$0xff]  ;;  %v24_v6 = vld [vmem:[%s4739_s0 + $0x18] sm:$0xff] }
   0x3   :  { %3115 = vmatpush3.bf16.msra.mxu0 %v3382_v0  ;;  %v149_v4 = vpack.c.bf16 %v22_v3, %v21_v2  ;;  %v25_v7 = vld [vmem:[%s4739_s0 + $0x20] sm:$0xff]  ;;  %v26_v8 = vld [vmem:[%s4739_s0 + $0x28] sm:$0xff]  ;;  %v150_v9 = vpack.c.bf16 %v24_v6, %v23_v5  ;;  %v27_v11 = vld [vmem:[%s4739_s0 + $0x30] sm:$0xff] }
   0x4   :  { %3116 = vmatprep.subr.bf16.mxu0 %v3383_v1  ;;  %v151_v10 = vpack.c.bf16 %v26_v8, %v25_v7  ;;  %v28_v12 = vld [vmem:[%s4739_s0 + $0x38] sm:$0xff]  ;;  %v29_v13 = vld [vmem:[%s4739_s0 + $0x40] sm:$0xff]  ;;  %v30_v14 = vld [vmem:[%s4739_s0 + $0x48] sm:$0xff] }
   0x5   :  { %3118 = vmatprep.mubr.msk.bf16.mxu0 %vm236_vm0, %v149_v4  ;;  %v152_v15 = vpack.c.bf16 %v28_v12, %v27_v11  ;;  %v153_v16 = vpack.c.bf16 %v30_v14, %v29_v13  ;;  %v31_v17 = vld [vmem:[%s4739_s0 + $0x50] sm:$0xff]  ;;  %v32_v18 = vld [vmem:[%s4739_s0 + $0x58] sm:$0xff]  ;;  %v33_v19 = vld [vmem:[%s4739_s0 + $0x60] sm:$0xff] }
   0x6   :  { %v34_v20 = vld [vmem:[%s4739_s0 + $0x68] sm:$0xff]  ;;  %v154_v21 = vpack.c.bf16 %v32_v18, %v31_v17  ;;  %v35_v23 = vld [vmem:[%s4739_s0 + $0x70] sm:$0xff]  ;;  %v36_v24 = vld [vmem:[%s4739_s0 + $0x78] sm:$0xff] }
   0x7   :  { %3117 = vmatpush3.bf16.msra.mxu0 %v3383_v1  ;;  %v155_v22 = vpack.c.bf16 %v34_v20, %v33_v19  ;;  %v37_v25 = vld [vmem:[%s4739_s0 + $0x80] sm:$0xff]  ;;  %v38_v26 = vld [vmem:[%s4739_s0 + $0x88] sm:$0xff]  ;;  %v156_v27 = vpack.c.bf16 %v36_v24, %v35_v23  ;;  %v39_v29 = vld [vmem:[%s4739_s0 + $0x90] sm:$0xff] }
   0x8   :  { %v157_v28 = vpack.c.bf16 %v38_v26, %v37_v25  ;;  %v40_v30 = vld [vmem:[%s4739_s0 + $0x98] sm:$0xff]  ;;  %v41_v31 = vld [vmem:[%s4739_s0 + $0xa0] sm:$0xff]  ;;  %v42_v32 = vld [vmem:[%s4739_s0 + $0xa8] sm:$0xff] }
   0x9   :  { %v158_v33 = vpack.c.bf16 %v40_v30, %v39_v29  ;;  %v159_v34 = vpack.c.bf16 %v42_v32, %v41_v31  ;;  %v43_v35 = vld [vmem:[%s4739_s0 + $0xb0] sm:$0xff]  ;;  %v44_v36 = vld [vmem:[%s4739_s0 + $0xb8] sm:$0xff]  ;;  %v45_v37 = vld [vmem:[%s4739_s0 + $0xc0] sm:$0xff] }
   0xa   :  { %3119 = vmatmul.mubr.msk.bf16.vlgmr.msra.gmra.mrb[0].mxu0 %vm236_vm0, %v150_v9  ;;  %v46_v38 = vld [vmem:[%s4739_s0 + $0xc8] sm:$0xff]  ;;  %v160_v39 = vpack.c.bf16 %v44_v36, %v43_v35  ;;  %v47_v41 = vld [vmem:[%s4739_s0 + $0xd0] sm:$0xff]  ;;  %v48_v42 = vld [vmem:[%s4739_s0 + $0xd8] sm:$0xff] }
   0xb   :  { %3122 = vmatprep.mubr.msk.bf16.mxu0 %vm236_vm0, %v151_v10  ;;  %v161_v40 = vpack.c.bf16 %v46_v38, %v45_v37  ;;  %v49_v43 = vld [vmem:[%s4739_s0 + $0xe0] sm:$0xff]  ;;  %v50_v44 = vld [vmem:[%s4739_s0 + $0xe8] sm:$0xff]  ;;  %v162_v45 = vpack.c.bf16 %v48_v42, %v47_v41  ;;  %v51_v47 = vld [vmem:[%s4739_s0 + $0xf0] sm:$0xff] }
   0xc   :  { %v163_v46 = vpack.c.bf16 %v50_v44, %v49_v43  ;;  %v52_v48 = vld [vmem:[%s4739_s0 + $0xf8] sm:$0xff]  ;;  %v53_v49 = vld [vmem:[%s4739_s0 + $0x100] sm:$0xff]  ;;  %v54_v50 = vld [vmem:[%s4739_s0 + $0x108] sm:$0xff] }
   0xd   :  { %v164_v51 = vpack.c.bf16 %v52_v48, %v51_v47  ;;  %v165_v52 = vpack.c.bf16 %v54_v50, %v53_v49  ;;  %v55_v53 = vld [vmem:[%s4739_s0 + $0x110] sm:$0xff]  ;;  %v56_v54 = vld [vmem:[%s4739_s0 + $0x118] sm:$0xff]  ;;  %v57_v55 = vld [vmem:[%s4739_s0 + $0x120] sm:$0xff] }
   0xe   :  { %v58_v56 = vld [vmem:[%s4739_s0 + $0x128] sm:$0xff]  ;;  %v166_v57 = vpack.c.bf16 %v56_v54, %v55_v53  ;;  %v59_v59 = vld [vmem:[%s4739_s0 + $0x130] sm:$0xff]  ;;  %v60_v60 = vld [vmem:[%s4739_s0 + $0x138] sm:$0xff] }
   0xf   :  { %v167_v58 = vpack.c.bf16 %v58_v56, %v57_v55  ;;  %v61_v61 = vld [vmem:[%s4739_s0 + $0x140] sm:$0xff]  ;;  %v62_v62 = vld [vmem:[%s4739_s0 + $0x148] sm:$0xff]  ;;  %v168_v63 = vpack.c.bf16 %v60_v60, %v59_v59  ;;  %v63_v1 = vld [vmem:[%s4739_s0 + $0x150] sm:$0xff] }
  0x10   :  { %v169_v0 = vpack.c.bf16 %v62_v62, %v61_v61  ;;  %v64_v2 = vld [vmem:[%s4739_s0 + $0x158] sm:$0xff]  ;;  %v3384_v3 = vld [vmem:[%s4740_s3] sm:$0xff]   ;;  %v66_v5 = vld [vmem:[%s4739_s0 + $0x168] sm:$0xff] }
  0x11   :  { %v65_v4 = vld [vmem:[%s4739_s0 + $0x160] sm:$0xff]  ;;  %3246 = vmatprep.subr.bf16.mxu1 %v3384_v3  ;;  %v170_v6 = vpack.c.bf16 %v64_v2, %v63_v1  ;;  %v3385_v8 = vld [vmem:[%s4740_s3 + $0x8] sm:$0xff]   ;;  %v67_v9 = vld [vmem:[%s4739_s0 + $0x170] sm:$0xff] }
  0x12   :  { %3123 = vmatmul.mubr.msk.bf16.gmra.mrb[4].mxu0 %vm236_vm0, %v152_v15  ;;  %3247 = vmatpush3.bf16.msra.mxu1 %v3384_v3  ;;  %v171_v7 = vpack.c.bf16 %v66_v5, %v65_v4  ;;  %v68_v10 = vld [vmem:[%s4739_s0 + $0x178] sm:$0xff]  ;;  %v69_v11 = vld [vmem:[%s4739_s0 + $0x180] sm:$0xff]  ;;  %v70_v12 = vld [vmem:[%s4739_s0 + $0x188] sm:$0xff] }
  0x13   :  { %3126 = vmatprep.mubr.msk.bf16.mxu0 %vm236_vm0, %v153_v16  ;;  %3248 = vmatprep.subr.bf16.mxu1 %v3385_v8  ;;  %v172_v13 = vpack.c.bf16 %v68_v10, %v67_v9  ;;  %v3386_v14 = vld [vmem:[%s4740_s3 + $0x10] sm:$0xff]   ;;  %v173_v15 = vpack.c.bf16 %v70_v12, %v69_v11  ;;  %v3387_v16 = vld [vmem:[%s4740_s3 + $0x18] sm:$0xff]   ;;  %v73_v19 = vld [vmem:[%s4739_s0 + $0x1a0] sm:$0xff] }
  0x14   :  { %v71_v17 = vld [vmem:[%s4739_s0 + $0x190] sm:$0xff]  ;;  %v72_v18 = vld [vmem:[%s4739_s0 + $0x198] sm:$0xff]  ;;  %v74_v20 = vld [vmem:[%s4739_s0 + $0x1a8] sm:$0xff] }
  0x15   :  { %v75_v23 = vld [vmem:[%s4739_s0 + $0x1b0] sm:$0xff]  ;;  %v76_v24 = vld [vmem:[%s4739_s0 + $0x1b8] sm:$0xff]  ;;  %v77_v25 = vld [vmem:[%s4739_s0 + $0x1c0] sm:$0xff] }
  0x16   :  { %3249 = vmatpush3.bf16.msra.mxu1 %v3385_v8  ;;  %v78_v26 = vld [vmem:[%s4739_s0 + $0x1c8] sm:$0xff]  ;;  %v79_v29 = vld [vmem:[%s4739_s0 + $0x1d0] sm:$0xff]  ;;  %v80_v30 = vld [vmem:[%s4739_s0 + $0x1d8] sm:$0xff] }
  0x17   :  { %3250 = vmatprep.subr.bf16.mxu1 %v3386_v14  ;;  %v81_v31 = vld [vmem:[%s4739_s0 + $0x1e0] sm:$0xff]  ;;  %v82_v32 = vld [vmem:[%s4739_s0 + $0x1e8] sm:$0xff]  ;;  %v83_v35 = vld [vmem:[%s4739_s0 + $0x1f0] sm:$0xff] }
  0x18   :  { %v84_v36 = vld [vmem:[%s4739_s0 + $0x1f8] sm:$0xff]  ;;  %v85_v37 = vld [vmem:[%s4739_s0 + $0x200] sm:$0xff]  ;;  %v86_v38 = vld [vmem:[%s4739_s0 + $0x208] sm:$0xff] }
  0x19   :  { %v87_v41 = vld [vmem:[%s4739_s0 + $0x210] sm:$0xff]  ;;  %v88_v42 = vld [vmem:[%s4739_s0 + $0x218] sm:$0xff]  ;;  %v89_v43 = vld [vmem:[%s4739_s0 + $0x220] sm:$0xff] }
  0x1a   :  { %3127 = vmatmul.mubr.msk.bf16.gmra.mrb[8].mxu0 %vm236_vm0, %v154_v21  ;;  %3251 = vmatpush3.bf16.msra.mxu1 %v3386_v14  ;;  %v174_v21 = vpack.c.bf16 %v72_v18, %v71_v17  ;;  %v90_v44 = vld [vmem:[%s4739_s0 + $0x228] sm:$0xff]  ;;  %v91_v47 = vld [vmem:[%s4739_s0 + $0x230] sm:$0xff]  ;;  %v92_v48 = vld [vmem:[%s4739_s0 + $0x238] sm:$0xff] }
  0x1b   :  { %3130 = vmatprep.mubr.msk.bf16.mxu0 %vm236_vm0, %v155_v22  ;;  %3252 = vmatprep.subr.bf16.mxu1 %v3387_v16  ;;  %v175_v22 = vpack.c.bf16 %v74_v20, %v73_v19  ;;  %v93_v49 = vld [vmem:[%s4739_s0 + $0x240] sm:$0xff]  ;;  %v94_v50 = vld [vmem:[%s4739_s0 + $0x248] sm:$0xff]  ;;  %v95_v53 = vld [vmem:[%s4739_s0 + $0x250] sm:$0xff] }
  0x1c   :  { %v96_v54 = vld [vmem:[%s4739_s0 + $0x258] sm:$0xff]  ;;  %v97_v55 = vld [vmem:[%s4739_s0 + $0x260] sm:$0xff]  ;;  %v98_v56 = vld [vmem:[%s4739_s0 + $0x268] sm:$0xff] }
  0x1d   :  { %v99_v59 = vld [vmem:[%s4739_s0 + $0x270] sm:$0xff]  ;;  %v100_v60 = vld [vmem:[%s4739_s0 + $0x278] sm:$0xff]  ;;  %v101_v61 = vld [vmem:[%s4739_s0 + $0x280] sm:$0xff] }
  0x1e   :  { %3253 = vmatpush3.bf16.msra.mxu1 %v3387_v16  ;;  %v102_v62 = vld [vmem:[%s4739_s0 + $0x288] sm:$0xff]  ;;  %v103_v1 = vld [vmem:[%s4739_s0 + $0x290] sm:$0xff]  ;;  %v104_v2 = vld [vmem:[%s4739_s0 + $0x298] sm:$0xff] }
  0x1f   :  { %v105_v3 = vld [vmem:[%s4739_s0 + $0x2a0] sm:$0xff]  ;;  %v106_v4 = vld [vmem:[%s4739_s0 + $0x2a8] sm:$0xff]  ;;  %v190_v5 = vpack.c.bf16 %v104_v2, %v103_v1  ;;  %v108_v8 = vld [vmem:[%s4739_s0 + $0x2b8] sm:$0xff] }
  0x20   :  { %v109_v9 = vld [vmem:[%s4739_s0 + $0x2c0] sm:$0xff]  ;;  %v110_v10 = vld [vmem:[%s4739_s0 + $0x2c8] sm:$0xff]  ;;  %v112_v14 = vld [vmem:[%s4739_s0 + $0x2d8] sm:$0xff] }
  0x21   :  { %v193_v12 = vpack.c.bf16 %v110_v10, %v109_v9  ;;  %v114_v16 = vld [vmem:[%s4739_s0 + $0x2e8] sm:$0xff]  ;;  %v115_v19 = vld [vmem:[%s4739_s0 + $0x2f0] sm:$0xff]  ;;  %v116_v20 = vld [vmem:[%s4739_s0 + $0x2f8] sm:$0xff] }
  0x22   :  { %3131 = vmatmul.mubr.msk.bf16.gmra.mrb[12].mxu0 %vm236_vm0, %v156_v27  ;;  %v176_v27 = vpack.c.bf16 %v76_v24, %v75_v23  ;;  %v196_v23 = vpack.c.bf16 %v116_v20, %v115_v19  ;;  %v137_v1 = vld [vmem:[%s4739_s0 + $0x3a0] sm:$0xff]  ;;  %v138_v2 = vld [vmem:[%s4739_s0 + $0x3a8] sm:$0xff]  ;;  %v140_v19 = vld [vmem:[%s4739_s0 + $0x3b8] sm:$0xff] }
  0x23   :  { %3134 = vmatprep.mubr.msk.bf16.mxu0 %vm236_vm0, %v157_v28  ;;  %v177_v28 = vpack.c.bf16 %v78_v26, %v77_v25  ;;  %v119_v25 = vld [vmem:[%s4739_s0 + $0x310] sm:$0xff]  ;;  %v120_v26 = vld [vmem:[%s4739_s0 + $0x318] sm:$0xff]  ;;  %v207_v10 = vpack.c.bf16 %v138_v2, %v137_v1 }
  0x2a   :  { %3135 = vmatmul.mubr.msk.bf16.gmra.mrb[16].mxu0 %vm236_vm0, %v158_v33  ;;  %v178_v33 = vpack.c.bf16 %v80_v30, %v79_v29  ;;  %v198_v29 = vpack.c.bf16 %v120_v26, %v119_v25 }
  0x2b   :  { %3138 = vmatprep.mubr.msk.bf16.mxu0 %vm236_vm0, %v159_v34  ;;  %v179_v34 = vpack.c.bf16 %v82_v32, %v81_v31  ;;  %v123_v31 = vld [vmem:[%s4739_s0 + $0x330] sm:$0xff]  ;;  %v124_v32 = vld [vmem:[%s4739_s0 + $0x338] sm:$0xff] }
  0x32   :  { %3139 = vmatmul.mubr.msk.bf16.gmra.mrb[20].mxu0 %vm236_vm0, %v160_v39  ;;  %v180_v39 = vpack.c.bf16 %v84_v36, %v83_v35  ;;  %v200_v35 = vpack.c.bf16 %v124_v32, %v123_v31 }
  0x33   :  { %3142 = vmatprep.mubr.msk.bf16.mxu0 %vm236_vm0, %v161_v40  ;;  %v181_v40 = vpack.c.bf16 %v86_v38, %v85_v37  ;;  %v127_v37 = vld [vmem:[%s4739_s0 + $0x350] sm:$0xff]  ;;  %v128_v38 = vld [vmem:[%s4739_s0 + $0x358] sm:$0xff] }
  0x3a   :  { %3143 = vmatmul.mubr.msk.bf16.gmra.mrb[24].mxu0 %vm236_vm0, %v162_v45  ;;  %v182_v45 = vpack.c.bf16 %v88_v42, %v87_v41  ;;  %v202_v41 = vpack.c.bf16 %v128_v38, %v127_v37  ;;  %v143_v38 = vld [vmem:[%s4739_s0 + $0x3d0] sm:$0xff] }
  0x3b   :  { %3146 = vmatprep.mubr.msk.bf16.mxu0 %vm236_vm0, %v163_v46  ;;  %v183_v46 = vpack.c.bf16 %v90_v44, %v89_v43  ;;  %v3825_v43 = vld [vmem:[%s4741_s2] ss:$0 sm:$0xff]  ;;  %v131_v44 = vld [vmem:[%s4739_s0 + $0x370] sm:$0xff] }
  0x42   :  { %3147 = vmatmul.mubr.msk.bf16.gmra.mrb[28].mxu0 %vm236_vm0, %v164_v51  ;;  %v184_v51 = vpack.c.bf16 %v92_v48, %v91_v47  ;;  %v134_v47 = vld [vmem:[%s4739_s0 + $0x388] sm:$0xff] }
  0x43   :  { %3150 = vmatprep.mubr.msk.bf16.mxu0 %vm236_vm0, %v165_v52  ;;  %v185_v52 = vpack.c.bf16 %v94_v50, %v93_v49 }
  0x4a   :  { %3151 = vmatmul.mubr.msk.bf16.gmra.mrb[32].mxu0 %vm236_vm0, %v166_v57  ;;  %v186_v57 = vpack.c.bf16 %v96_v54, %v95_v53 }
  0x4b   :  { %3154 = vmatprep.mubr.msk.bf16.mxu0 %vm236_vm0, %v167_v58  ;;  %v187_v58 = vpack.c.bf16 %v98_v56, %v97_v55 }
  0x52   :  { %3155 = vmatmul.mubr.msk.bf16.gmra.mrb[36].mxu0 %vm236_vm0, %v168_v63  ;;  %v188_v63 = vpack.c.bf16 %v100_v60, %v99_v59 }
  0x53   :  { %3158 = vmatprep.mubr.msk.bf16.mxu0 %vm236_vm0, %v169_v0  ;;  %v189_v0 = vpack.c.bf16 %v102_v62, %v101_v61  ;;  %v135_v62 = vld [vmem:[%s4739_s0 + $0x390] sm:$0xff] }
  0x5a   :  { %3159 = vmatmul.mubr.msk.bf16.gmra.mrb[40].mxu0 %vm236_vm0, %v170_v6  ;;  %v191_v6 = vpack.c.bf16 %v106_v4, %v105_v3 }
  0x5b   :  { %3162 = vmatprep.mubr.msk.bf16.mxu0 %vm236_vm0, %v171_v7  ;;  %v107_v7 = vld [vmem:[%s4739_s0 + $0x2b0] sm:$0xff] }
  0x5c   :  { %v192_v11 = vpack.c.bf16 %v108_v8, %v107_v7 }
  0x62   :  { %3163 = vmatmul.mubr.msk.bf16.gmra.mrb[44].mxu0 %vm236_vm0, %v172_v13  ;;  %v111_v13 = vld [vmem:[%s4739_s0 + $0x2d0] sm:$0xff] }
  0x63   :  { %3166 = vmatprep.mubr.msk.bf16.mxu0 %vm236_vm0, %v173_v15  ;;  %v113_v15 = vld [vmem:[%s4739_s0 + $0x2e0] sm:$0xff]  ;;  %v194_v17 = vpack.c.bf16 %v112_v14, %v111_v13 }
  0x64   :  { %v195_v18 = vpack.c.bf16 %v114_v16, %v113_v15 }
  0x6a   :  { %3167 = vmatmul.mubr.msk.bf16.gmra.mrb[48].mxu0 %vm236_vm0, %v174_v21  ;;  %v117_v21 = vld [vmem:[%s4739_s0 + $0x300] sm:$0xff] }
  0x6b   :  { %3170 = vmatprep.mubr.msk.bf16.mxu0 %vm236_vm0, %v175_v22  ;;  %v118_v22 = vld [vmem:[%s4739_s0 + $0x308] sm:$0xff] }
  0x6c   :  { %v197_v24 = vpack.c.bf16 %v118_v22, %v117_v21  ;;  %v141_v21 = vld [vmem:[%s4739_s0 + $0x3c0] sm:$0xff]  ;;  %v142_v22 = vld [vmem:[%s4739_s0 + $0x3c8] sm:$0xff] }
  0x72   :  { %3171 = vmatmul.mubr.msk.bf16.gmra.mrb[52].mxu0 %vm236_vm0, %v176_v27  ;;  %v121_v27 = vld [vmem:[%s4739_s0 + $0x320] sm:$0xff] }
  0x73   :  { %3174 = vmatprep.mubr.msk.bf16.mxu0 %vm236_vm0, %v177_v28  ;;  %v122_v28 = vld [vmem:[%s4739_s0 + $0x328] sm:$0xff] }
  0x74   :  { %v199_v30 = vpack.c.bf16 %v122_v28, %v121_v27 }
  0x7a   :  { %3175 = vmatmul.mubr.msk.bf16.gmra.mrb[56].mxu0 %vm236_vm0, %v178_v33  ;;  %v125_v33 = vld [vmem:[%s4739_s0 + $0x340] sm:$0xff] }
  0x7b   :  { %3178 = vmatprep.mubr.msk.bf16.mxu0 %vm236_vm0, %v179_v34  ;;  %v126_v34 = vld [vmem:[%s4739_s0 + $0x348] sm:$0xff] }
  0x7c   :  { %v201_v36 = vpack.c.bf16 %v126_v34, %v125_v33 }
  0x82   :  { %3179 = vmatmul.mubr.msk.bf16.gmra.mrb[60].mxu0 %vm236_vm0, %v180_v39  ;;  %v129_v39 = vld [vmem:[%s4739_s0 + $0x360] sm:$0xff] }
  0x83   :  { %3182 = vmatprep.mubr.msk.bf16.mxu0 %vm236_vm0, %v181_v40  ;;  %v130_v40 = vld [vmem:[%s4739_s0 + $0x368] sm:$0xff] }
  0x84   :  { %v203_v42 = vpack.c.bf16 %v130_v40, %v129_v39  ;;  %v144_v39 = vld [vmem:[%s4739_s0 + $0x3d8] sm:$0xff] }
  0x8a   :  { %3183 = vmatmul.mubr.msk.bf16.gmra.mrb[64].mxu0 %vm236_vm0, %v182_v45  ;;  %v132_v45 = vld [vmem:[%s4739_s0 + $0x378] sm:$0xff] }
  0x8b   :  { %3186 = vmatprep.mubr.msk.bf16.mxu0 %vm236_vm0, %v183_v46  ;;  %v133_v46 = vld [vmem:[%s4739_s0 + $0x380] sm:$0xff] }
  0x8c   :  { %v205_v54 = vpack.c.bf16 %v134_v47, %v133_v46 }
  0x92   :  { %3187 = vmatmul.mubr.msk.bf16.gmra.mrb[68].mxu0 %vm236_vm0, %v184_v51  ;;  %v204_v51 = vpack.c.bf16 %v132_v45, %v131_v44 }
  0x93   :  { %3190 = vmatprep.mubr.msk.bf16.mxu0 %vm236_vm0, %v185_v52 }
  0x9a   :  { %3191 = vmatmul.mubr.msk.bf16.gmra.mrb[72].mxu0 %vm236_vm0, %v186_v57 }
  0x9b   :  { %3194 = vmatprep.mubr.msk.bf16.mxu0 %vm236_vm0, %v187_v58 }
  0xa2   :  { %3195 = vmatmul.mubr.msk.bf16.gmra.mrb[76].mxu0 %vm236_vm0, %v188_v63  ;;  %v136_v63 = vld [vmem:[%s4739_s0 + $0x398] sm:$0xff] }
  0xa3   :  { %3198 = vmatprep.mubr.msk.bf16.mxu0 %vm236_vm0, %v189_v0  ;;  %v206_v7 = vpack.c.bf16 %v136_v63, %v135_v62 }
  0xaa   :  { %3199 = vmatmul.mubr.msk.bf16.gmra.mrb[80].mxu0 %vm236_vm0, %v190_v5 }
  0xab   :  { %3202 = vmatprep.mubr.msk.bf16.mxu0 %vm236_vm0, %v191_v6 }
  0xb2   :  { %3203 = vmatmul.mubr.msk.bf16.gmra.mrb[84].mxu0 %vm236_vm0, %v192_v11 }
  0xb3   :  { %3206 = vmatprep.mubr.msk.bf16.mxu0 %vm236_vm0, %v193_v12 }
  0xba   :  { %3207 = vmatmul.mubr.msk.bf16.gmra.mrb[88].mxu0 %vm236_vm0, %v194_v17 }
  0xbb   :  { %3210 = vmatprep.mubr.msk.bf16.mxu0 %vm236_vm0, %v195_v18  ;;  %v139_v18 = vld [vmem:[%s4739_s0 + $0x3b0] sm:$0xff] }
  0xbc   :  { %v208_v27 = vpack.c.bf16 %v140_v19, %v139_v18 }
  0xc2   :  { %3211 = vmatmul.mubr.msk.bf16.gmra.mrb[92].mxu0 %vm236_vm0, %v196_v23 }
  0xc3   :  { %3214 = vmatprep.mubr.msk.bf16.mxu0 %vm236_vm0, %v197_v24 }
  0xca   :  { %3215 = vmatmul.mubr.msk.bf16.gmra.mrb[96].mxu0 %vm236_vm0, %v198_v29 }
  0xcb   :  { %3218 = vmatprep.mubr.msk.bf16.mxu0 %vm236_vm0, %v199_v30  ;;  %v209_v30 = vpack.c.bf16 %v142_v22, %v141_v21 }
  0xd2   :  { %3219 = vmatmul.mubr.msk.bf16.gmra.mrb[100].mxu0 %vm236_vm0, %v200_v35 }
  0xd3   :  { %3222 = vmatprep.mubr.msk.bf16.mxu0 %vm236_vm0, %v201_v36 }
  0xda   :  { %3223 = vmatmul.mubr.msk.bf16.gmra.mrb[104].mxu0 %vm236_vm0, %v202_v41  ;;  %v145_v41 = vld [vmem:[%s4739_s0 + $0x3e0] sm:$0xff] }
  0xdb   :  { %3226 = vmatprep.mubr.msk.bf16.mxu0 %vm236_vm0, %v203_v42  ;;  %v146_v42 = vld [vmem:[%s4739_s0 + $0x3e8] sm:$0xff] }
  0xdd   :  { %v3120_v48 = vpop.f32.mrb[0].mxu0 }
  0xde   :  { %v472_v49 = vadd.f32 %v3120_v48, %v3825_v43  ;;  %v463_v50 = vpop.f32.mrb[1].mxu0  ;;  %v210_v48 = vpack.c.bf16 %v144_v39, %v143_v38 }
  0xdf   :  { %v464_v52 = vadd.f32 %v3825_v43, %v463_v50  ;;  %v3121_v53 = vpop.f32.mrb[2].mxu0 }
  0xe0   :  { %v475_v55 = vadd.f32 %v3121_v53, %v3825_v43  ;;  %v466_v56 = vpop.f32.mrb[3].mxu0  ;;  %v976_v58 = vmax.f32 %v472_v49, 0.0 }
  0xe1   :  { %v467_v57 = vadd.f32 %v3825_v43, %v466_v56  ;;  %v974_v60 = vmax.f32 %v464_v52, 0.0 }
  0xe2   :  { %v977_v59 = vmax.f32 %v475_v55, 0.0  ;;  %3227 = vmatmul.mubr.msk.bf16.gmra.mrb[108].mxu0 %vm236_vm0, %v204_v51  ;;  %v211_v51 = vpack.c.bf16 %v146_v42, %v145_v41 }
  0xe3   :  { %v975_v61 = vmax.f32 %v467_v57, 0.0  ;;  %3230 = vmatprep.mubr.msk.bf16.mxu0 %vm236_vm0, %v205_v54 }
  0xe4   :  { %v1103_v0 = vpack.c.bf16 %v977_v59, %v976_v58  ;;  %v147_v59 = vld [vmem:[%s4739_s0 + $0x3f0] sm:$0xff] }
  0xe5   :  { %v3124_v3 = vpop.f32.mrb[4].mxu0  ;;  %v1102_v4 = vpack.c.bf16 %v975_v61, %v974_v60  ;;  %v148_v60 = vld [vmem:[%s4739_s0 + $0x3f8] sm:$0xff] }
  0xe6   :  { %v488_v5 = vadd.f32 %v3124_v3, %v3825_v43  ;;  %v479_v6 = vpop.f32.mrb[5].mxu0  ;;  %v212_v2 = vpack.c.bf16 %v148_v60, %v147_v59 }
  0xe7   :  { %v480_v8 = vadd.f32 %v3825_v43, %v479_v6  ;;  %v3125_v9 = vpop.f32.mrb[6].mxu0  ;;  %3254 = vmatprep.mubr.msk.bf16.mxu1 %vm1205_vm1, %v1102_v4 }
  0xe8   :  { %v491_v11 = vadd.f32 %v3125_v9, %v3825_v43  ;;  %v482_v12 = vpop.f32.mrb[7].mxu0  ;;  %3255 = vmatmul.mubr.msk.bf16.vlgmr.msra.gmra.mrb[0].mxu1 %vm1205_vm1, %v1103_v0  ;;  %v980_v14 = vmax.f32 %v488_v5, 0.0 }
  0xe9   :  { %v483_v13 = vadd.f32 %v3825_v43, %v482_v12  ;;  %v978_v16 = vmax.f32 %v480_v8, 0.0 }
  0xea   :  { %v981_v15 = vmax.f32 %v491_v11, 0.0  ;;  %3231 = vmatmul.mubr.msk.bf16.gmra.mrb[112].mxu0 %vm236_vm0, %v206_v7 }
  0xeb   :  { %v979_v17 = vmax.f32 %v483_v13, 0.0  ;;  %3234 = vmatprep.mubr.msk.bf16.mxu0 %vm236_vm0, %v207_v10 }
  0xec   :  { %v1105_v20 = vpack.c.bf16 %v981_v15, %v980_v14 }
  0xed   :  { %v1104_v23 = vpack.c.bf16 %v979_v17, %v978_v16  ;;  %v3128_v24 = vpop.f32.mrb[8].mxu0 }
  0xee   :  { %v504_v25 = vadd.f32 %v3128_v24, %v3825_v43  ;;  %v495_v26 = vpop.f32.mrb[9].mxu0 }
  0xef   :  { %v496_v28 = vadd.f32 %v3825_v43, %v495_v26  ;;  %v3129_v29 = vpop.f32.mrb[10].mxu0  ;;  %3258 = vmatprep.mubr.msk.bf16.mxu1 %vm1205_vm1, %v1104_v23 }
  0xf0   :  { %v507_v31 = vadd.f32 %v3129_v29, %v3825_v43  ;;  %v498_v32 = vpop.f32.mrb[11].mxu0  ;;  %3259 = vmatmul.mubr.msk.bf16.gmra.mrb[4].mxu1 %vm1205_vm1, %v1105_v20  ;;  %v984_v34 = vmax.f32 %v504_v25, 0.0 }
  0xf1   :  { %v499_v33 = vadd.f32 %v3825_v43, %v498_v32  ;;  %v982_v36 = vmax.f32 %v496_v28, 0.0 }
  0xf2   :  { %v985_v35 = vmax.f32 %v507_v31, 0.0  ;;  %3235 = vmatmul.mubr.msk.bf16.gmra.mrb[116].mxu0 %vm236_vm0, %v208_v27 }
  0xf3   :  { %v983_v37 = vmax.f32 %v499_v33, 0.0  ;;  %3238 = vmatprep.mubr.msk.bf16.mxu0 %vm236_vm0, %v209_v30 }
  0xf4   :  { %v1107_v40 = vpack.c.bf16 %v985_v35, %v984_v34 }
  0xf5   :  { %v1106_v44 = vpack.c.bf16 %v983_v37, %v982_v36  ;;  %v3132_v45 = vpop.f32.mrb[12].mxu0 }
  0xf6   :  { %v520_v46 = vadd.f32 %v3132_v45, %v3825_v43  ;;  %v511_v47 = vpop.f32.mrb[13].mxu0 }
  0xf7   :  { %v512_v49 = vadd.f32 %v3825_v43, %v511_v47  ;;  %v3133_v50 = vpop.f32.mrb[14].mxu0  ;;  %3262 = vmatprep.mubr.msk.bf16.mxu1 %vm1205_vm1, %v1106_v44 }
  0xf8   :  { %v523_v52 = vadd.f32 %v3133_v50, %v3825_v43  ;;  %v514_v53 = vpop.f32.mrb[15].mxu0  ;;  %3263 = vmatmul.mubr.msk.bf16.gmra.mrb[8].mxu1 %vm1205_vm1, %v1107_v40  ;;  %v988_v55 = vmax.f32 %v520_v46, 0.0 }
  0xf9   :  { %v515_v54 = vadd.f32 %v3825_v43, %v514_v53  ;;  %v986_v57 = vmax.f32 %v512_v49, 0.0 }
  0xfa   :  { %v989_v56 = vmax.f32 %v523_v52, 0.0  ;;  %3239 = vmatmul.mubr.msk.bf16.gmra.mrb[120].mxu0 %vm236_vm0, %v210_v48 }
  0xfb   :  { %v987_v58 = vmax.f32 %v515_v54, 0.0  ;;  %3242 = vmatprep.mubr.msk.bf16.mxu0 %vm236_vm0, %v211_v51 }
  0xfc   :  { %v1109_v61 = vpack.c.bf16 %v989_v56, %v988_v55 }
  0xfd   :  { %v1108_v62 = vpack.c.bf16 %v987_v58, %v986_v57  ;;  %v3136_v63 = vpop.f32.mrb[16].mxu0 }
  0xfe   :  { %v536_v0 = vadd.f32 %v3136_v63, %v3825_v43  ;;  %v527_v1 = vpop.f32.mrb[17].mxu0 }
  0xff   :  { %v528_v3 = vadd.f32 %v3825_v43, %v527_v1  ;;  %v3137_v4 = vpop.f32.mrb[18].mxu0  ;;  %3266 = vmatprep.mubr.msk.bf16.mxu1 %vm1205_vm1, %v1108_v62 }
 0x100   :  { %v539_v5 = vadd.f32 %v3137_v4, %v3825_v43  ;;  %v530_v6 = vpop.f32.mrb[19].mxu0  ;;  %3267 = vmatmul.mubr.msk.bf16.gmra.mrb[12].mxu1 %vm1205_vm1, %v1109_v61  ;;  %v992_v8 = vmax.f32 %v536_v0, 0.0 }
 0x101   :  { %v531_v7 = vadd.f32 %v3825_v43, %v530_v6  ;;  %v990_v10 = vmax.f32 %v528_v3, 0.0 }
 0x102   :  { %v993_v9 = vmax.f32 %v539_v5, 0.0  ;;  %3243 = vmatmul.mubr.msk.bf16.gmra.mrb[124].mxu0 %vm236_vm0, %v212_v2 }
 0x103   :  { %v991_v11 = vmax.f32 %v531_v7, 0.0 }
 0x104   :  { %v1111_v12 = vpack.c.bf16 %v993_v9, %v992_v8 }
 0x105   :  { %v1110_v13 = vpack.c.bf16 %v991_v11, %v990_v10  ;;  %v3140_v14 = vpop.f32.mrb[20].mxu0 }
 0x106   :  { %v552_v15 = vadd.f32 %v3140_v14, %v3825_v43  ;;  %v543_v16 = vpop.f32.mrb[21].mxu0 }
 0x107   :  { %v544_v17 = vadd.f32 %v3825_v43, %v543_v16  ;;  %v3141_v18 = vpop.f32.mrb[22].mxu0  ;;  %3270 = vmatprep.mubr.msk.bf16.mxu1 %vm1205_vm1, %v1110_v13 }
 0x108   :  { %v555_v19 = vadd.f32 %v3141_v18, %v3825_v43  ;;  %v546_v20 = vpop.f32.mrb[23].mxu0  ;;  %3271 = vmatmul.mubr.msk.bf16.gmra.mrb[16].mxu1 %vm1205_vm1, %v1111_v12  ;;  %v996_v22 = vmax.f32 %v552_v15, 0.0 }
 0x109   :  { %v547_v21 = vadd.f32 %v3825_v43, %v546_v20  ;;  %v994_v24 = vmax.f32 %v544_v17, 0.0 }
 0x10a   :  { %v997_v23 = vmax.f32 %v555_v19, 0.0 }
 0x10b   :  { %v995_v25 = vmax.f32 %v547_v21, 0.0 }
 0x10c   :  { %v1113_v26 = vpack.c.bf16 %v997_v23, %v996_v22 }
 0x10d   :  { %v1112_v27 = vpack.c.bf16 %v995_v25, %v994_v24  ;;  %v3144_v28 = vpop.f32.mrb[24].mxu0 }
 0x10e   :  { %v568_v29 = vadd.f32 %v3144_v28, %v3825_v43  ;;  %v559_v30 = vpop.f32.mrb[25].mxu0 }
 0x10f   :  { %v560_v31 = vadd.f32 %v3825_v43, %v559_v30  ;;  %v3145_v32 = vpop.f32.mrb[26].mxu0  ;;  %3274 = vmatprep.mubr.msk.bf16.mxu1 %vm1205_vm1, %v1112_v27 }
 0x110   :  { %v571_v33 = vadd.f32 %v3145_v32, %v3825_v43  ;;  %v562_v34 = vpop.f32.mrb[27].mxu0  ;;  %3275 = vmatmul.mubr.msk.bf16.gmra.mrb[20].mxu1 %vm1205_vm1, %v1113_v26  ;;  %v1000_v36 = vmax.f32 %v568_v29, 0.0 }
 0x111   :  { %v563_v35 = vadd.f32 %v3825_v43, %v562_v34  ;;  %v998_v38 = vmax.f32 %v560_v31, 0.0 }
 0x112   :  { %v1001_v37 = vmax.f32 %v571_v33, 0.0 }
 0x113   :  { %v999_v39 = vmax.f32 %v563_v35, 0.0 }
 0x114   :  { %v1115_v40 = vpack.c.bf16 %v1001_v37, %v1000_v36 }
 0x115   :  { %v1114_v41 = vpack.c.bf16 %v999_v39, %v998_v38  ;;  %v3148_v42 = vpop.f32.mrb[28].mxu0 }
 0x116   :  { %v584_v44 = vadd.f32 %v3148_v42, %v3825_v43  ;;  %v575_v45 = vpop.f32.mrb[29].mxu0 }
 0x117   :  { %v576_v46 = vadd.f32 %v3825_v43, %v575_v45  ;;  %v3149_v47 = vpop.f32.mrb[30].mxu0  ;;  %3278 = vmatprep.mubr.msk.bf16.mxu1 %vm1205_vm1, %v1114_v41 }
 0x118   :  { %v587_v48 = vadd.f32 %v3149_v47, %v3825_v43  ;;  %v578_v49 = vpop.f32.mrb[31].mxu0  ;;  %3279 = vmatmul.mubr.msk.bf16.gmra.mrb[24].mxu1 %vm1205_vm1, %v1115_v40  ;;  %v1004_v51 = vmax.f32 %v584_v44, 0.0 }
 0x119   :  { %v579_v50 = vadd.f32 %v3825_v43, %v578_v49  ;;  %v1002_v53 = vmax.f32 %v576_v46, 0.0 }
 0x11a   :  { %v1005_v52 = vmax.f32 %v587_v48, 0.0 }
 0x11b   :  { %v1003_v54 = vmax.f32 %v579_v50, 0.0 }
 0x11c   :  { %v1117_v55 = vpack.c.bf16 %v1005_v52, %v1004_v51 }
 0x11d   :  { %v1116_v56 = vpack.c.bf16 %v1003_v54, %v1002_v53  ;;  %v3152_v57 = vpop.f32.mrb[32].mxu0 }
 0x11e   :  { %v600_v58 = vadd.f32 %v3152_v57, %v3825_v43  ;;  %v591_v59 = vpop.f32.mrb[33].mxu0 }
 0x11f   :  { %v592_v60 = vadd.f32 %v3825_v43, %v591_v59  ;;  %v3153_v61 = vpop.f32.mrb[34].mxu0  ;;  %3282 = vmatprep.mubr.msk.bf16.mxu1 %vm1205_vm1, %v1116_v56 }
 0x120   :  { %v603_v62 = vadd.f32 %v3153_v61, %v3825_v43  ;;  %v594_v63 = vpop.f32.mrb[35].mxu0  ;;  %3283 = vmatmul.mubr.msk.bf16.gmra.mrb[28].mxu1 %vm1205_vm1, %v1117_v55  ;;  %v1008_v1 = vmax.f32 %v600_v58, 0.0 }
 0x121   :  { %v595_v0 = vadd.f32 %v3825_v43, %v594_v63  ;;  %v1006_v3 = vmax.f32 %v592_v60, 0.0 }
 0x122   :  { %v1009_v2 = vmax.f32 %v603_v62, 0.0 }
 0x123   :  { %v1007_v4 = vmax.f32 %v595_v0, 0.0 }
 0x124   :  { %v1119_v5 = vpack.c.bf16 %v1009_v2, %v1008_v1 }
 0x125   :  { %v1118_v6 = vpack.c.bf16 %v1007_v4, %v1006_v3  ;;  %v3156_v7 = vpop.f32.mrb[36].mxu0 }
 0x126   :  { %v616_v8 = vadd.f32 %v3156_v7, %v3825_v43  ;;  %v607_v9 = vpop.f32.mrb[37].mxu0 }
 0x127   :  { %v608_v10 = vadd.f32 %v3825_v43, %v607_v9  ;;  %v3157_v11 = vpop.f32.mrb[38].mxu0  ;;  %3286 = vmatprep.mubr.msk.bf16.mxu1 %vm1205_vm1, %v1118_v6 }
 0x128   :  { %v619_v12 = vadd.f32 %v3157_v11, %v3825_v43  ;;  %v610_v13 = vpop.f32.mrb[39].mxu0  ;;  %3287 = vmatmul.mubr.msk.bf16.gmra.mrb[32].mxu1 %vm1205_vm1, %v1119_v5  ;;  %v1012_v15 = vmax.f32 %v616_v8, 0.0 }
 0x129   :  { %v611_v14 = vadd.f32 %v3825_v43, %v610_v13  ;;  %v1010_v17 = vmax.f32 %v608_v10, 0.0 }
 0x12a   :  { %v1013_v16 = vmax.f32 %v619_v12, 0.0 }
 0x12b   :  { %v1011_v18 = vmax.f32 %v611_v14, 0.0 }
 0x12c   :  { %v1121_v19 = vpack.c.bf16 %v1013_v16, %v1012_v15 }
 0x12d   :  { %v1120_v20 = vpack.c.bf16 %v1011_v18, %v1010_v17  ;;  %v3160_v21 = vpop.f32.mrb[40].mxu0 }
 0x12e   :  { %v632_v22 = vadd.f32 %v3160_v21, %v3825_v43  ;;  %v623_v23 = vpop.f32.mrb[41].mxu0 }
 0x12f   :  { %v624_v24 = vadd.f32 %v3825_v43, %v623_v23  ;;  %v3161_v25 = vpop.f32.mrb[42].mxu0  ;;  %3290 = vmatprep.mubr.msk.bf16.mxu1 %vm1205_vm1, %v1120_v20 }
 0x130   :  { %v635_v26 = vadd.f32 %v3161_v25, %v3825_v43  ;;  %v626_v27 = vpop.f32.mrb[43].mxu0  ;;  %3291 = vmatmul.mubr.msk.bf16.gmra.mrb[36].mxu1 %vm1205_vm1, %v1121_v19  ;;  %v1016_v29 = vmax.f32 %v632_v22, 0.0 }
 0x131   :  { %v627_v28 = vadd.f32 %v3825_v43, %v626_v27  ;;  %v1014_v31 = vmax.f32 %v624_v24, 0.0 }
 0x132   :  { %v1017_v30 = vmax.f32 %v635_v26, 0.0 }
 0x133   :  { %v1015_v32 = vmax.f32 %v627_v28, 0.0 }
 0x134   :  { %v1123_v33 = vpack.c.bf16 %v1017_v30, %v1016_v29 }
 0x135   :  { %v1122_v34 = vpack.c.bf16 %v1015_v32, %v1014_v31  ;;  %v3164_v35 = vpop.f32.mrb[44].mxu0 }
 0x136   :  { %v648_v36 = vadd.f32 %v3164_v35, %v3825_v43  ;;  %v639_v37 = vpop.f32.mrb[45].mxu0 }
 0x137   :  { %v640_v38 = vadd.f32 %v3825_v43, %v639_v37  ;;  %v3165_v39 = vpop.f32.mrb[46].mxu0  ;;  %3294 = vmatprep.mubr.msk.bf16.mxu1 %vm1205_vm1, %v1122_v34 }
 0x138   :  { %v651_v40 = vadd.f32 %v3165_v39, %v3825_v43  ;;  %v642_v41 = vpop.f32.mrb[47].mxu0  ;;  %3295 = vmatmul.mubr.msk.bf16.gmra.mrb[40].mxu1 %vm1205_vm1, %v1123_v33  ;;  %v1020_v44 = vmax.f32 %v648_v36, 0.0 }
 0x139   :  { %v643_v42 = vadd.f32 %v3825_v43, %v642_v41  ;;  %v1018_v46 = vmax.f32 %v640_v38, 0.0 }
 0x13a   :  { %v1021_v45 = vmax.f32 %v651_v40, 0.0 }
 0x13b   :  { %v1019_v47 = vmax.f32 %v643_v42, 0.0 }
 0x13c   :  { %v1125_v48 = vpack.c.bf16 %v1021_v45, %v1020_v44 }
 0x13d   :  { %v1124_v49 = vpack.c.bf16 %v1019_v47, %v1018_v46  ;;  %v3168_v50 = vpop.f32.mrb[48].mxu0 }
 0x13e   :  { %v664_v51 = vadd.f32 %v3168_v50, %v3825_v43  ;;  %v655_v52 = vpop.f32.mrb[49].mxu0 }
 0x13f   :  { %v656_v53 = vadd.f32 %v3825_v43, %v655_v52  ;;  %v3169_v54 = vpop.f32.mrb[50].mxu0  ;;  %3298 = vmatprep.mubr.msk.bf16.mxu1 %vm1205_vm1, %v1124_v49 }
 0x140   :  { %v667_v55 = vadd.f32 %v3169_v54, %v3825_v43  ;;  %v658_v56 = vpop.f32.mrb[51].mxu0  ;;  %3299 = vmatmul.mubr.msk.bf16.gmra.mrb[44].mxu1 %vm1205_vm1, %v1125_v48  ;;  %v1024_v58 = vmax.f32 %v664_v51, 0.0 }
 0x141   :  { %v659_v57 = vadd.f32 %v3825_v43, %v658_v56  ;;  %v1022_v60 = vmax.f32 %v656_v53, 0.0 }
 0x142   :  { %v1025_v59 = vmax.f32 %v667_v55, 0.0 }
 0x143   :  { %v1023_v61 = vmax.f32 %v659_v57, 0.0 }
 0x144   :  { %v1127_v62 = vpack.c.bf16 %v1025_v59, %v1024_v58 }
 0x145   :  { %v1126_v63 = vpack.c.bf16 %v1023_v61, %v1022_v60  ;;  %v3172_v0 = vpop.f32.mrb[52].mxu0 }
 0x146   :  { %v680_v1 = vadd.f32 %v3172_v0, %v3825_v43  ;;  %v671_v2 = vpop.f32.mrb[53].mxu0 }
 0x147   :  { %v672_v3 = vadd.f32 %v3825_v43, %v671_v2  ;;  %v3173_v4 = vpop.f32.mrb[54].mxu0  ;;  %3302 = vmatprep.mubr.msk.bf16.mxu1 %vm1205_vm1, %v1126_v63 }
 0x148   :  { %v683_v5 = vadd.f32 %v3173_v4, %v3825_v43  ;;  %v674_v6 = vpop.f32.mrb[55].mxu0  ;;  %3303 = vmatmul.mubr.msk.bf16.gmra.mrb[48].mxu1 %vm1205_vm1, %v1127_v62  ;;  %v1028_v8 = vmax.f32 %v680_v1, 0.0 }
 0x149   :  { %v675_v7 = vadd.f32 %v3825_v43, %v674_v6  ;;  %v1026_v10 = vmax.f32 %v672_v3, 0.0 }
 0x14a   :  { %v1029_v9 = vmax.f32 %v683_v5, 0.0 }
 0x14b   :  { %v1027_v11 = vmax.f32 %v675_v7, 0.0 }
 0x14c   :  { %v1129_v12 = vpack.c.bf16 %v1029_v9, %v1028_v8 }
 0x14d   :  { %v1128_v13 = vpack.c.bf16 %v1027_v11, %v1026_v10  ;;  %v3176_v14 = vpop.f32.mrb[56].mxu0 }
 0x14e   :  { %v696_v15 = vadd.f32 %v3176_v14, %v3825_v43  ;;  %v687_v16 = vpop.f32.mrb[57].mxu0 }
 0x14f   :  { %v688_v17 = vadd.f32 %v3825_v43, %v687_v16  ;;  %v3177_v18 = vpop.f32.mrb[58].mxu0  ;;  %3306 = vmatprep.mubr.msk.bf16.mxu1 %vm1205_vm1, %v1128_v13 }
 0x150   :  { %v699_v19 = vadd.f32 %v3177_v18, %v3825_v43  ;;  %v690_v20 = vpop.f32.mrb[59].mxu0  ;;  %3307 = vmatmul.mubr.msk.bf16.gmra.mrb[52].mxu1 %vm1205_vm1, %v1129_v12  ;;  %v1032_v22 = vmax.f32 %v696_v15, 0.0 }
 0x151   :  { %v691_v21 = vadd.f32 %v3825_v43, %v690_v20  ;;  %v1030_v24 = vmax.f32 %v688_v17, 0.0 }
 0x152   :  { %v1033_v23 = vmax.f32 %v699_v19, 0.0 }
 0x153   :  { %v1031_v25 = vmax.f32 %v691_v21, 0.0 }
 0x154   :  { %v1131_v26 = vpack.c.bf16 %v1033_v23, %v1032_v22 }
 0x155   :  { %v1130_v27 = vpack.c.bf16 %v1031_v25, %v1030_v24  ;;  %v3180_v28 = vpop.f32.mrb[60].mxu0 }
 0x156   :  { %v712_v29 = vadd.f32 %v3180_v28, %v3825_v43  ;;  %v703_v30 = vpop.f32.mrb[61].mxu0 }
 0x157   :  { %v704_v31 = vadd.f32 %v3825_v43, %v703_v30  ;;  %v3181_v32 = vpop.f32.mrb[62].mxu0  ;;  %3310 = vmatprep.mubr.msk.bf16.mxu1 %vm1205_vm1, %v1130_v27 }
 0x158   :  { %v715_v33 = vadd.f32 %v3181_v32, %v3825_v43  ;;  %v706_v34 = vpop.f32.mrb[63].mxu0  ;;  %3311 = vmatmul.mubr.msk.bf16.gmra.mrb[56].mxu1 %vm1205_vm1, %v1131_v26  ;;  %v1036_v36 = vmax.f32 %v712_v29, 0.0 }
 0x159   :  { %v707_v35 = vadd.f32 %v3825_v43, %v706_v34  ;;  %v1034_v38 = vmax.f32 %v704_v31, 0.0 }
 0x15a   :  { %v1037_v37 = vmax.f32 %v715_v33, 0.0 }
 0x15b   :  { %v1035_v39 = vmax.f32 %v707_v35, 0.0 }
 0x15c   :  { %v1133_v40 = vpack.c.bf16 %v1037_v37, %v1036_v36 }
 0x15d   :  { %v1132_v41 = vpack.c.bf16 %v1035_v39, %v1034_v38  ;;  %v3184_v42 = vpop.f32.mrb[64].mxu0 }
 0x15e   :  { %v728_v44 = vadd.f32 %v3184_v42, %v3825_v43  ;;  %v719_v45 = vpop.f32.mrb[65].mxu0 }
 0x15f   :  { %v720_v46 = vadd.f32 %v3825_v43, %v719_v45  ;;  %v3185_v47 = vpop.f32.mrb[66].mxu0  ;;  %3314 = vmatprep.mubr.msk.bf16.mxu1 %vm1205_vm1, %v1132_v41 }
 0x160   :  { %v731_v48 = vadd.f32 %v3185_v47, %v3825_v43  ;;  %v722_v49 = vpop.f32.mrb[67].mxu0  ;;  %3315 = vmatmul.mubr.msk.bf16.gmra.mrb[60].mxu1 %vm1205_vm1, %v1133_v40  ;;  %v1040_v51 = vmax.f32 %v728_v44, 0.0 }
 0x161   :  { %v723_v50 = vadd.f32 %v3825_v43, %v722_v49  ;;  %v1038_v53 = vmax.f32 %v720_v46, 0.0 }
 0x162   :  { %v1041_v52 = vmax.f32 %v731_v48, 0.0 }
 0x163   :  { %v1039_v54 = vmax.f32 %v723_v50, 0.0 }
 0x164   :  { %v1135_v55 = vpack.c.bf16 %v1041_v52, %v1040_v51 }
 0x165   :  { %v1134_v56 = vpack.c.bf16 %v1039_v54, %v1038_v53  ;;  %v3188_v57 = vpop.f32.mrb[68].mxu0 }
 0x166   :  { %v744_v58 = vadd.f32 %v3188_v57, %v3825_v43  ;;  %v735_v59 = vpop.f32.mrb[69].mxu0 }
 0x167   :  { %v736_v60 = vadd.f32 %v3825_v43, %v735_v59  ;;  %v3189_v61 = vpop.f32.mrb[70].mxu0  ;;  %3318 = vmatprep.mubr.msk.bf16.mxu1 %vm1205_vm1, %v1134_v56 }
 0x168   :  { %v747_v62 = vadd.f32 %v3189_v61, %v3825_v43  ;;  %v738_v63 = vpop.f32.mrb[71].mxu0  ;;  %3319 = vmatmul.mubr.msk.bf16.gmra.mrb[64].mxu1 %vm1205_vm1, %v1135_v55  ;;  %v1044_v1 = vmax.f32 %v744_v58, 0.0 }
 0x169   :  { %v739_v0 = vadd.f32 %v3825_v43, %v738_v63  ;;  %v1042_v3 = vmax.f32 %v736_v60, 0.0 }
 0x16a   :  { %v1045_v2 = vmax.f32 %v747_v62, 0.0 }
 0x16b   :  { %v1043_v4 = vmax.f32 %v739_v0, 0.0 }
 0x16c   :  { %v1137_v5 = vpack.c.bf16 %v1045_v2, %v1044_v1 }
 0x16d   :  { %v1136_v6 = vpack.c.bf16 %v1043_v4, %v1042_v3  ;;  %v3192_v7 = vpop.f32.mrb[72].mxu0 }
 0x16e   :  { %v760_v8 = vadd.f32 %v3192_v7, %v3825_v43  ;;  %v751_v9 = vpop.f32.mrb[73].mxu0 }
 0x16f   :  { %v752_v10 = vadd.f32 %v3825_v43, %v751_v9  ;;  %v3193_v11 = vpop.f32.mrb[74].mxu0  ;;  %3322 = vmatprep.mubr.msk.bf16.mxu1 %vm1205_vm1, %v1136_v6 }
 0x170   :  { %v763_v12 = vadd.f32 %v3193_v11, %v3825_v43  ;;  %v754_v13 = vpop.f32.mrb[75].mxu0  ;;  %3323 = vmatmul.mubr.msk.bf16.gmra.mrb[68].mxu1 %vm1205_vm1, %v1137_v5  ;;  %v1048_v15 = vmax.f32 %v760_v8, 0.0 }
 0x171   :  { %v755_v14 = vadd.f32 %v3825_v43, %v754_v13  ;;  %v1046_v17 = vmax.f32 %v752_v10, 0.0 }
 0x172   :  { %v1049_v16 = vmax.f32 %v763_v12, 0.0 }
 0x173   :  { %v1047_v18 = vmax.f32 %v755_v14, 0.0 }
 0x174   :  { %v1139_v19 = vpack.c.bf16 %v1049_v16, %v1048_v15 }
 0x175   :  { %v1138_v20 = vpack.c.bf16 %v1047_v18, %v1046_v17  ;;  %v3196_v21 = vpop.f32.mrb[76].mxu0 }
 0x176   :  { %v776_v22 = vadd.f32 %v3196_v21, %v3825_v43  ;;  %v767_v23 = vpop.f32.mrb[77].mxu0 }
 0x177   :  { %v768_v24 = vadd.f32 %v3825_v43, %v767_v23  ;;  %v3197_v25 = vpop.f32.mrb[78].mxu0  ;;  %3326 = vmatprep.mubr.msk.bf16.mxu1 %vm1205_vm1, %v1138_v20 }
 0x178   :  { %v779_v26 = vadd.f32 %v3197_v25, %v3825_v43  ;;  %v770_v27 = vpop.f32.mrb[79].mxu0  ;;  %3327 = vmatmul.mubr.msk.bf16.gmra.mrb[72].mxu1 %vm1205_vm1, %v1139_v19  ;;  %v1052_v29 = vmax.f32 %v776_v22, 0.0 }
 0x179   :  { %v771_v28 = vadd.f32 %v3825_v43, %v770_v27  ;;  %v1050_v31 = vmax.f32 %v768_v24, 0.0 }
 0x17a   :  { %v1053_v30 = vmax.f32 %v779_v26, 0.0 }
 0x17b   :  { %v1051_v32 = vmax.f32 %v771_v28, 0.0 }
 0x17c   :  { %v1141_v33 = vpack.c.bf16 %v1053_v30, %v1052_v29 }
 0x17d   :  { %v1140_v34 = vpack.c.bf16 %v1051_v32, %v1050_v31  ;;  %v3200_v35 = vpop.f32.mrb[80].mxu0 }
 0x17e   :  { %v792_v36 = vadd.f32 %v3200_v35, %v3825_v43  ;;  %v783_v37 = vpop.f32.mrb[81].mxu0 }
 0x17f   :  { %v784_v38 = vadd.f32 %v3825_v43, %v783_v37  ;;  %v3201_v39 = vpop.f32.mrb[82].mxu0  ;;  %3330 = vmatprep.mubr.msk.bf16.mxu1 %vm1205_vm1, %v1140_v34 }
 0x180   :  { %v795_v40 = vadd.f32 %v3201_v39, %v3825_v43  ;;  %v786_v41 = vpop.f32.mrb[83].mxu0  ;;  %3331 = vmatmul.mubr.msk.bf16.gmra.mrb[76].mxu1 %vm1205_vm1, %v1141_v33  ;;  %v1056_v44 = vmax.f32 %v792_v36, 0.0 }
 0x181   :  { %v787_v42 = vadd.f32 %v3825_v43, %v786_v41  ;;  %v1054_v46 = vmax.f32 %v784_v38, 0.0 }
 0x182   :  { %v1057_v45 = vmax.f32 %v795_v40, 0.0 }
 0x183   :  { %v1055_v47 = vmax.f32 %v787_v42, 0.0 }
 0x184   :  { %v1143_v48 = vpack.c.bf16 %v1057_v45, %v1056_v44 }
 0x185   :  { %v1142_v49 = vpack.c.bf16 %v1055_v47, %v1054_v46  ;;  %v3204_v50 = vpop.f32.mrb[84].mxu0 }
 0x186   :  { %v808_v51 = vadd.f32 %v3204_v50, %v3825_v43  ;;  %v799_v52 = vpop.f32.mrb[85].mxu0 }
 0x187   :  { %v800_v53 = vadd.f32 %v3825_v43, %v799_v52  ;;  %v3205_v54 = vpop.f32.mrb[86].mxu0  ;;  %3334 = vmatprep.mubr.msk.bf16.mxu1 %vm1205_vm1, %v1142_v49 }
 0x188   :  { %v811_v55 = vadd.f32 %v3205_v54, %v3825_v43  ;;  %v802_v56 = vpop.f32.mrb[87].mxu0  ;;  %3335 = vmatmul.mubr.msk.bf16.gmra.mrb[80].mxu1 %vm1205_vm1, %v1143_v48  ;;  %v1060_v58 = vmax.f32 %v808_v51, 0.0 }
 0x189   :  { %v803_v57 = vadd.f32 %v3825_v43, %v802_v56  ;;  %v1058_v60 = vmax.f32 %v800_v53, 0.0 }
 0x18a   :  { %v1061_v59 = vmax.f32 %v811_v55, 0.0 }
 0x18b   :  { %v1059_v61 = vmax.f32 %v803_v57, 0.0 }
 0x18c   :  { %v1145_v62 = vpack.c.bf16 %v1061_v59, %v1060_v58 }
 0x18d   :  { %v1144_v63 = vpack.c.bf16 %v1059_v61, %v1058_v60  ;;  %v3208_v0 = vpop.f32.mrb[88].mxu0 }
 0x18e   :  { %v824_v1 = vadd.f32 %v3208_v0, %v3825_v43  ;;  %v815_v2 = vpop.f32.mrb[89].mxu0 }
 0x18f   :  { %v816_v3 = vadd.f32 %v3825_v43, %v815_v2  ;;  %v3209_v4 = vpop.f32.mrb[90].mxu0  ;;  %3338 = vmatprep.mubr.msk.bf16.mxu1 %vm1205_vm1, %v1144_v63 }
 0x190   :  { %v827_v5 = vadd.f32 %v3209_v4, %v3825_v43  ;;  %v818_v6 = vpop.f32.mrb[91].mxu0  ;;  %3339 = vmatmul.mubr.msk.bf16.gmra.mrb[84].mxu1 %vm1205_vm1, %v1145_v62  ;;  %v1064_v8 = vmax.f32 %v824_v1, 0.0 }
 0x191   :  { %v819_v7 = vadd.f32 %v3825_v43, %v818_v6  ;;  %v1062_v10 = vmax.f32 %v816_v3, 0.0 }
 0x192   :  { %v1065_v9 = vmax.f32 %v827_v5, 0.0 }
 0x193   :  { %v1063_v11 = vmax.f32 %v819_v7, 0.0 }
 0x194   :  { %v1147_v12 = vpack.c.bf16 %v1065_v9, %v1064_v8 }
 0x195   :  { %v1146_v13 = vpack.c.bf16 %v1063_v11, %v1062_v10  ;;  %v3212_v14 = vpop.f32.mrb[92].mxu0 }
 0x196   :  { %v840_v15 = vadd.f32 %v3212_v14, %v3825_v43  ;;  %v831_v16 = vpop.f32.mrb[93].mxu0 }
 0x197   :  { %v832_v17 = vadd.f32 %v3825_v43, %v831_v16  ;;  %v3213_v18 = vpop.f32.mrb[94].mxu0  ;;  %3342 = vmatprep.mubr.msk.bf16.mxu1 %vm1205_vm1, %v1146_v13 }
 0x198   :  { %v843_v19 = vadd.f32 %v3213_v18, %v3825_v43  ;;  %v834_v20 = vpop.f32.mrb[95].mxu0  ;;  %3343 = vmatmul.mubr.msk.bf16.gmra.mrb[88].mxu1 %vm1205_vm1, %v1147_v12  ;;  %v1068_v22 = vmax.f32 %v840_v15, 0.0  ;;  %v4060_v15 = vld [vmem:[%s4742_s4] ss:$0 sm:$0xff] }
 0x199   :  { %v835_v21 = vadd.f32 %v3825_v43, %v834_v20  ;;  %v1066_v24 = vmax.f32 %v832_v17, 0.0 }
 0x19a   :  { %v1069_v23 = vmax.f32 %v843_v19, 0.0 }
 0x19b   :  { %v1067_v25 = vmax.f32 %v835_v21, 0.0 }
 0x19c   :  { %v1149_v26 = vpack.c.bf16 %v1069_v23, %v1068_v22 }
 0x19d   :  { %v1148_v27 = vpack.c.bf16 %v1067_v25, %v1066_v24  ;;  %v3216_v28 = vpop.f32.mrb[96].mxu0 }
 0x19e   :  { %v856_v29 = vadd.f32 %v3216_v28, %v3825_v43  ;;  %v847_v30 = vpop.f32.mrb[97].mxu0 }
 0x19f   :  { %v848_v31 = vadd.f32 %v3825_v43, %v847_v30  ;;  %v3217_v32 = vpop.f32.mrb[98].mxu0  ;;  %3346 = vmatprep.mubr.msk.bf16.mxu1 %vm1205_vm1, %v1148_v27 }
 0x1a0   :  { %v859_v33 = vadd.f32 %v3217_v32, %v3825_v43  ;;  %v850_v34 = vpop.f32.mrb[99].mxu0  ;;  %3347 = vmatmul.mubr.msk.bf16.gmra.mrb[92].mxu1 %vm1205_vm1, %v1149_v26  ;;  %v1072_v36 = vmax.f32 %v856_v29, 0.0 }
 0x1a1   :  { %v851_v35 = vadd.f32 %v3825_v43, %v850_v34  ;;  %v1070_v38 = vmax.f32 %v848_v31, 0.0 }
 0x1a2   :  { %v1073_v37 = vmax.f32 %v859_v33, 0.0 }
 0x1a3   :  { %v1071_v39 = vmax.f32 %v851_v35, 0.0 }
 0x1a4   :  { %v1151_v40 = vpack.c.bf16 %v1073_v37, %v1072_v36 }
 0x1a5   :  { %v1150_v41 = vpack.c.bf16 %v1071_v39, %v1070_v38  ;;  %v3220_v42 = vpop.f32.mrb[100].mxu0 }
 0x1a6   :  { %v872_v44 = vadd.f32 %v3220_v42, %v3825_v43  ;;  %v863_v45 = vpop.f32.mrb[101].mxu0 }
 0x1a7   :  { %v864_v46 = vadd.f32 %v3825_v43, %v863_v45  ;;  %v3221_v47 = vpop.f32.mrb[102].mxu0  ;;  %3350 = vmatprep.mubr.msk.bf16.mxu1 %vm1205_vm1, %v1150_v41  ;;  %v4082_v41 = vld [vmem:[%s4741_s2] ss:$0 sm:$0xff] }
 0x1a8   :  { %v875_v48 = vadd.f32 %v3221_v47, %v3825_v43  ;;  %v866_v49 = vpop.f32.mrb[103].mxu0  ;;  %3351 = vmatmul.mubr.msk.bf16.gmra.mrb[96].mxu1 %vm1205_vm1, %v1151_v40  ;;  %v1076_v51 = vmax.f32 %v872_v44, 0.0 }
 0x1a9   :  { %v867_v50 = vadd.f32 %v3825_v43, %v866_v49  ;;  %v1074_v53 = vmax.f32 %v864_v46, 0.0 }
 0x1aa   :  { %v1077_v52 = vmax.f32 %v875_v48, 0.0 }
 0x1ab   :  { %v1075_v54 = vmax.f32 %v867_v50, 0.0 }
 0x1ac   :  { %v1153_v55 = vpack.c.bf16 %v1077_v52, %v1076_v51 }
 0x1ad   :  { %v1152_v56 = vpack.c.bf16 %v1075_v54, %v1074_v53  ;;  %v3224_v57 = vpop.f32.mrb[104].mxu0 }
 0x1ae   :  { %v888_v58 = vadd.f32 %v3224_v57, %v3825_v43  ;;  %v879_v59 = vpop.f32.mrb[105].mxu0 }
 0x1af   :  { %v880_v60 = vadd.f32 %v3825_v43, %v879_v59  ;;  %v3225_v61 = vpop.f32.mrb[106].mxu0  ;;  %3354 = vmatprep.mubr.msk.bf16.mxu1 %vm1205_vm1, %v1152_v56 }
 0x1b0   :  { %v891_v62 = vadd.f32 %v3225_v61, %v3825_v43  ;;  %v882_v63 = vpop.f32.mrb[107].mxu0  ;;  %3355 = vmatmul.mubr.msk.bf16.gmra.mrb[100].mxu1 %vm1205_vm1, %v1153_v55  ;;  %v1080_v1 = vmax.f32 %v888_v58, 0.0 }
 0x1b1   :  { %v883_v0 = vadd.f32 %v3825_v43, %v882_v63  ;;  %v1078_v3 = vmax.f32 %v880_v60, 0.0 }
 0x1b2   :  { %v1081_v2 = vmax.f32 %v891_v62, 0.0 }
 0x1b3   :  { %v1079_v4 = vmax.f32 %v883_v0, 0.0 }
 0x1b4   :  { %v1155_v5 = vpack.c.bf16 %v1081_v2, %v1080_v1 }
 0x1b5   :  { %v1154_v6 = vpack.c.bf16 %v1079_v4, %v1078_v3  ;;  %v3228_v7 = vpop.f32.mrb[108].mxu0 }
 0x1b6   :  { %v904_v8 = vadd.f32 %v3228_v7, %v3825_v43  ;;  %v895_v9 = vpop.f32.mrb[109].mxu0 }
 0x1b7   :  { %v896_v10 = vadd.f32 %v3825_v43, %v895_v9  ;;  %v3229_v11 = vpop.f32.mrb[110].mxu0  ;;  %3358 = vmatprep.mubr.msk.bf16.mxu1 %vm1205_vm1, %v1154_v6 }
 0x1b8   :  { %v907_v12 = vadd.f32 %v3229_v11, %v3825_v43  ;;  %v898_v13 = vpop.f32.mrb[111].mxu0  ;;  %3359 = vmatmul.mubr.msk.bf16.gmra.mrb[104].mxu1 %vm1205_vm1, %v1155_v5  ;;  %v1084_v16 = vmax.f32 %v904_v8, 0.0 }
 0x1b9   :  { %v899_v14 = vadd.f32 %v3825_v43, %v898_v13  ;;  %v1082_v18 = vmax.f32 %v896_v10, 0.0 }
 0x1ba   :  { %v1085_v17 = vmax.f32 %v907_v12, 0.0 }
 0x1bb   :  { %v1083_v19 = vmax.f32 %v899_v14, 0.0  ;;  %v3256_v20 = vpop.f32.mrb[0].mxu1 }
 0x1bc   :  { %v1157_v21 = vpack.c.bf16 %v1085_v17, %v1084_v16  ;;  %v1441_v22 = vadd.f32 %v3256_v20, %v4060_v15  ;;  %v1432_v23 = vpop.f32.mrb[1].mxu1 }
 0x1bd   :  { %v1156_v24 = vpack.c.bf16 %v1083_v19, %v1082_v18  ;;  %v1433_v25 = vadd.f32 %v4060_v15, %v1432_v23  ;;  %v3232_v26 = vpop.f32.mrb[112].mxu0  ;;  %v3257_v27 = vpop.f32.mrb[2].mxu1 }
 0x1be   :  { %v2854_v28 = vpack.c.bf16 %v1441_v22, %v1441_v22  ;;  %v920_v29 = vadd.f32 %v3232_v26, %v3825_v43  ;;  %v1444_v30 = vadd.f32 %v3257_v27, %v4060_v15  ;;  %v911_v31 = vpop.f32.mrb[113].mxu0  ;;  %v1435_v32 = vpop.f32.mrb[3].mxu1 }
 0x1bf   :  { %v2852_v33 = vpack.c.bf16 %v1433_v25, %v1433_v25  ;;  %v912_v34 = vadd.f32 %v3825_v43, %v911_v31  ;;  %v1436_v35 = vadd.f32 %v4060_v15, %v1435_v32  ;;  %v3233_v36 = vpop.f32.mrb[114].mxu0  ;;  %3362 = vmatprep.mubr.msk.bf16.mxu1 %vm1205_vm1, %v1156_v24 }
 0x1c0   :  { %2458 = vst.msk [vmem:[%s4743_s5 + $0x8] sm:$0xf] %vm2455_vm2, %v2854_v28  ;;  %v2855_v37 = vpack.c.bf16 %v1444_v30, %v1444_v30  ;;  %v923_v38 = vadd.f32 %v3233_v36, %v3825_v43  ;;  %v914_v39 = vpop.f32.mrb[115].mxu0  ;;  %3363 = vmatmul.mubr.msk.bf16.gmra.mrb[108].mxu1 %vm1205_vm1, %v1157_v21  ;;  %v1088_v44 = vmax.f32 %v920_v29, 0.0 }
 0x1c1   :  { %2456 = vst.msk [vmem:[%s4743_s5] sm:$0xf] %vm2455_vm2, %v2852_v33  ;;  %v2853_v40 = vpack.c.bf16 %v1436_v35, %v1436_v35  ;;  %v915_v42 = vadd.f32 %v4082_v41, %v914_v39  ;;  %v1086_v45 = vmax.f32 %v912_v34, 0.0 }
 0x1c2   :  { %2459 = vst.msk [vmem:[%s4743_s5 + $0xc] sm:$0xf] %vm2455_vm2, %v2855_v37  ;;  %v1089_v43 = vmax.f32 %v923_v38, 0.0 }
 0x1c3   :  { %2457 = vst.msk [vmem:[%s4743_s5 + $0x4] sm:$0xf] %vm2455_vm2, %v2853_v40  ;;  %v1087_v46 = vmax.f32 %v915_v42, 0.0  ;;  %v3260_v47 = vpop.f32.mrb[4].mxu1 }
 0x1c4   :  { %v1159_v48 = vpack.c.bf16 %v1089_v43, %v1088_v44  ;;  %v1457_v49 = vadd.f32 %v3260_v47, %v4060_v15  ;;  %v1448_v50 = vpop.f32.mrb[5].mxu1 }
 0x1c5   :  { %v1158_v51 = vpack.c.bf16 %v1087_v46, %v1086_v45  ;;  %v1449_v52 = vadd.f32 %v4060_v15, %v1448_v50  ;;  %v3236_v53 = vpop.f32.mrb[116].mxu0  ;;  %v3261_v54 = vpop.f32.mrb[6].mxu1 }
 0x1c6   :  { %v2858_v55 = vpack.c.bf16 %v1457_v49, %v1457_v49  ;;  %v936_v56 = vadd.f32 %v4082_v41, %v3236_v53  ;;  %v1460_v57 = vadd.f32 %v3261_v54, %v4060_v15  ;;  %v927_v58 = vpop.f32.mrb[117].mxu0  ;;  %v1451_v59 = vpop.f32.mrb[7].mxu1 }
 0x1c7   :  { %v2856_v60 = vpack.c.bf16 %v1449_v52, %v1449_v52  ;;  %v928_v61 = vadd.f32 %v4082_v41, %v927_v58  ;;  %v1452_v62 = vadd.f32 %v4060_v15, %v1451_v59  ;;  %v3237_v63 = vpop.f32.mrb[118].mxu0  ;;  %3366 = vmatprep.mubr.msk.bf16.mxu1 %vm1205_vm1, %v1158_v51 }
 0x1c8   :  { %2462 = vst.msk [vmem:[%s4743_s5 + $0x18] sm:$0xf] %vm2455_vm2, %v2858_v55  ;;  %v2859_v0 = vpack.c.bf16 %v1460_v57, %v1460_v57  ;;  %v939_v1 = vadd.f32 %v4082_v41, %v3237_v63  ;;  %v930_v2 = vpop.f32.mrb[119].mxu0  ;;  %3367 = vmatmul.mubr.msk.bf16.gmra.mrb[112].mxu1 %vm1205_vm1, %v1159_v48  ;;  %v1092_v5 = vmax.f32 %v936_v56, 0.0 }
 0x1c9   :  { %2460 = vst.msk [vmem:[%s4743_s5 + $0x10] sm:$0xf] %vm2455_vm2, %v2856_v60  ;;  %v2857_v3 = vpack.c.bf16 %v1452_v62, %v1452_v62  ;;  %v931_v4 = vadd.f32 %v4082_v41, %v930_v2  ;;  %v1090_v7 = vmax.f32 %v928_v61, 0.0 }
 0x1ca   :  { %2463 = vst.msk [vmem:[%s4743_s5 + $0x1c] sm:$0xf] %vm2455_vm2, %v2859_v0  ;;  %v1093_v6 = vmax.f32 %v939_v1, 0.0 }
 0x1cb   :  { %2461 = vst.msk [vmem:[%s4743_s5 + $0x14] sm:$0xf] %vm2455_vm2, %v2857_v3  ;;  %v1091_v8 = vmax.f32 %v931_v4, 0.0  ;;  %v3264_v9 = vpop.f32.mrb[8].mxu1 }
 0x1cc   :  { %v1161_v10 = vpack.c.bf16 %v1093_v6, %v1092_v5  ;;  %v1473_v11 = vadd.f32 %v3264_v9, %v4060_v15  ;;  %v1464_v12 = vpop.f32.mrb[9].mxu1 }
 0x1cd   :  { %v1160_v13 = vpack.c.bf16 %v1091_v8, %v1090_v7  ;;  %v1465_v14 = vadd.f32 %v4060_v15, %v1464_v12  ;;  %v3240_v16 = vpop.f32.mrb[120].mxu0  ;;  %v3265_v17 = vpop.f32.mrb[10].mxu1 }
 0x1ce   :  { %v2862_v18 = vpack.c.bf16 %v1473_v11, %v1473_v11  ;;  %v952_v19 = vadd.f32 %v4082_v41, %v3240_v16  ;;  %v1476_v20 = vadd.f32 %v3265_v17, %v4060_v15  ;;  %v943_v21 = vpop.f32.mrb[121].mxu0  ;;  %v1467_v22 = vpop.f32.mrb[11].mxu1 }
 0x1cf   :  { %v2860_v23 = vpack.c.bf16 %v1465_v14, %v1465_v14  ;;  %v944_v24 = vadd.f32 %v4082_v41, %v943_v21  ;;  %v1468_v25 = vadd.f32 %v4060_v15, %v1467_v22  ;;  %v3241_v26 = vpop.f32.mrb[122].mxu0  ;;  %3370 = vmatprep.mubr.msk.bf16.mxu1 %vm1205_vm1, %v1160_v13 }
 0x1d0   :  { %2466 = vst.msk [vmem:[%s4743_s5 + $0x28] sm:$0xf] %vm2455_vm2, %v2862_v18  ;;  %v2863_v27 = vpack.c.bf16 %v1476_v20, %v1476_v20  ;;  %v955_v28 = vadd.f32 %v4082_v41, %v3241_v26  ;;  %v946_v29 = vpop.f32.mrb[123].mxu0  ;;  %3371 = vmatmul.mubr.msk.bf16.gmra.mrb[116].mxu1 %vm1205_vm1, %v1161_v10  ;;  %v1096_v32 = vmax.f32 %v952_v19, 0.0 }
 0x1d1   :  { %2464 = vst.msk [vmem:[%s4743_s5 + $0x20] sm:$0xf] %vm2455_vm2, %v2860_v23  ;;  %v2861_v30 = vpack.c.bf16 %v1468_v25, %v1468_v25  ;;  %v947_v31 = vadd.f32 %v4082_v41, %v946_v29  ;;  %v1094_v34 = vmax.f32 %v944_v24, 0.0 }
 0x1d2   :  { %2467 = vst.msk [vmem:[%s4743_s5 + $0x2c] sm:$0xf] %vm2455_vm2, %v2863_v27  ;;  %v1097_v33 = vmax.f32 %v955_v28, 0.0 }
 0x1d3   :  { %2465 = vst.msk [vmem:[%s4743_s5 + $0x24] sm:$0xf] %vm2455_vm2, %v2861_v30  ;;  %v1095_v35 = vmax.f32 %v947_v31, 0.0  ;;  %v3268_v36 = vpop.f32.mrb[12].mxu1 }
 0x1d4   :  { %v1163_v37 = vpack.c.bf16 %v1097_v33, %v1096_v32  ;;  %v1489_v38 = vadd.f32 %v3268_v36, %v4060_v15  ;;  %v1480_v39 = vpop.f32.mrb[13].mxu1 }
 0x1d5   :  { %v1162_v40 = vpack.c.bf16 %v1095_v35, %v1094_v34  ;;  %v1481_v42 = vadd.f32 %v4060_v15, %v1480_v39  ;;  %v3244_v44 = vpop.f32.mrb[124].mxu0  ;;  %v3269_v43 = vpop.f32.mrb[14].mxu1 }
 0x1d6   :  { %v2866_v45 = vpack.c.bf16 %v1489_v38, %v1489_v38  ;;  %v968_v46 = vadd.f32 %v4082_v41, %v3244_v44  ;;  %v1492_v47 = vadd.f32 %v3269_v43, %v4060_v15  ;;  %v959_v48 = vpop.f32.mrb[125].mxu0  ;;  %v1483_v49 = vpop.f32.mrb[15].mxu1 }
 0x1d7   :  { %v2864_v50 = vpack.c.bf16 %v1481_v42, %v1481_v42  ;;  %v960_v51 = vadd.f32 %v4082_v41, %v959_v48  ;;  %v1484_v52 = vadd.f32 %v4060_v15, %v1483_v49  ;;  %v3245_v53 = vpop.f32.mrb[126].mxu0  ;;  %3374 = vmatprep.mubr.msk.bf16.mxu1 %vm1205_vm1, %v1162_v40 }
 0x1d8   :  { %2470 = vst.msk [vmem:[%s4743_s5 + $0x38] sm:$0xf] %vm2455_vm2, %v2866_v45  ;;  %v2867_v54 = vpack.c.bf16 %v1492_v47, %v1492_v47  ;;  %v971_v55 = vadd.f32 %v4082_v41, %v3245_v53  ;;  %v962_v56 = vpop.f32.mrb[127].mxu0  ;;  %3375 = vmatmul.mubr.msk.bf16.gmra.mrb[120].mxu1 %vm1205_vm1, %v1163_v37  ;;  %v1100_v59 = vmax.f32 %v968_v46, 0.0 }
 0x1d9   :  { %2468 = vst.msk [vmem:[%s4743_s5 + $0x30] sm:$0xf] %vm2455_vm2, %v2864_v50  ;;  %v2865_v57 = vpack.c.bf16 %v1484_v52, %v1484_v52  ;;  %v963_v58 = vadd.f32 %v4082_v41, %v962_v56  ;;  %v1098_v61 = vmax.f32 %v960_v51, 0.0 }
 0x1da   :  { %2471 = vst.msk [vmem:[%s4743_s5 + $0x3c] sm:$0xf] %vm2455_vm2, %v2867_v54  ;;  %v1101_v60 = vmax.f32 %v971_v55, 0.0 }
 0x1db   :  { %2469 = vst.msk [vmem:[%s4743_s5 + $0x34] sm:$0xf] %vm2455_vm2, %v2865_v57  ;;  %v1099_v62 = vmax.f32 %v963_v58, 0.0  ;;  %v3272_v63 = vpop.f32.mrb[16].mxu1 }
 0x1dc   :  { %v1165_v0 = vpack.c.bf16 %v1101_v60, %v1100_v59  ;;  %v1505_v1 = vadd.f32 %v3272_v63, %v4060_v15  ;;  %v1496_v2 = vpop.f32.mrb[17].mxu1 }
 0x1dd   :  { %v1164_v41 = vpack.c.bf16 %v1099_v62, %v1098_v61  ;;  %v1497_v3 = vadd.f32 %v4060_v15, %v1496_v2  ;;  %v3273_v4 = vpop.f32.mrb[18].mxu1 }
 0x1de   :  { %v2870_v5 = vpack.c.bf16 %v1505_v1, %v1505_v1  ;;  %v1508_v6 = vadd.f32 %v3273_v4, %v4060_v15  ;;  %v1499_v7 = vpop.f32.mrb[19].mxu1 }
 0x1df   :  { %v2868_v8 = vpack.c.bf16 %v1497_v3, %v1497_v3  ;;  %v1500_v9 = vadd.f32 %v4060_v15, %v1499_v7  ;;  %3378 = vmatprep.mubr.msk.bf16.mxu1 %vm1205_vm1, %v1164_v41 }
 0x1e0   :  { %2474 = vst.msk [vmem:[%s4743_s5 + $0x48] sm:$0xf] %vm2455_vm2, %v2870_v5  ;;  %v2871_v10 = vpack.c.bf16 %v1508_v6, %v1508_v6  ;;  %3379 = vmatmul.mubr.msk.bf16.gmra.mrb[124].mxu1 %vm1205_vm1, %v1165_v0 }
 0x1e1   :  { %2472 = vst.msk [vmem:[%s4743_s5 + $0x40] sm:$0xf] %vm2455_vm2, %v2868_v8  ;;  %v2869_v11 = vpack.c.bf16 %v1500_v9, %v1500_v9 }
 0x1e2   :  { %2475 = vst.msk [vmem:[%s4743_s5 + $0x4c] sm:$0xf] %vm2455_vm2, %v2871_v10 }
 0x1e3   :  { %2473 = vst.msk [vmem:[%s4743_s5 + $0x44] sm:$0xf] %vm2455_vm2, %v2869_v11  ;;  %v3276_v12 = vpop.f32.mrb[20].mxu1 }
 0x1e4   :  { %v1521_v13 = vadd.f32 %v3276_v12, %v4060_v15  ;;  %v1512_v14 = vpop.f32.mrb[21].mxu1 }
 0x1e5   :  { %v1513_v16 = vadd.f32 %v4060_v15, %v1512_v14  ;;  %v3277_v17 = vpop.f32.mrb[22].mxu1 }
 0x1e6   :  { %v2874_v18 = vpack.c.bf16 %v1521_v13, %v1521_v13  ;;  %v1524_v19 = vadd.f32 %v3277_v17, %v4060_v15  ;;  %v1515_v20 = vpop.f32.mrb[23].mxu1 }
 0x1e7   :  { %v2872_v21 = vpack.c.bf16 %v1513_v16, %v1513_v16  ;;  %v1516_v22 = vadd.f32 %v4060_v15, %v1515_v20 }
 0x1e8   :  { %2478 = vst.msk [vmem:[%s4743_s5 + $0x58] sm:$0xf] %vm2455_vm2, %v2874_v18  ;;  %v2875_v23 = vpack.c.bf16 %v1524_v19, %v1524_v19 }
 0x1e9   :  { %2476 = vst.msk [vmem:[%s4743_s5 + $0x50] sm:$0xf] %vm2455_vm2, %v2872_v21  ;;  %v2873_v24 = vpack.c.bf16 %v1516_v22, %v1516_v22 }
 0x1ea   :  { %2479 = vst.msk [vmem:[%s4743_s5 + $0x5c] sm:$0xf] %vm2455_vm2, %v2875_v23 }
 0x1eb   :  { %2477 = vst.msk [vmem:[%s4743_s5 + $0x54] sm:$0xf] %vm2455_vm2, %v2873_v24  ;;  %v3280_v25 = vpop.f32.mrb[24].mxu1 }
 0x1ec   :  { %v1537_v26 = vadd.f32 %v3280_v25, %v4060_v15  ;;  %v1528_v27 = vpop.f32.mrb[25].mxu1 }
 0x1ed   :  { %v1529_v28 = vadd.f32 %v4060_v15, %v1528_v27  ;;  %v3281_v29 = vpop.f32.mrb[26].mxu1 }
 0x1ee   :  { %v2878_v30 = vpack.c.bf16 %v1537_v26, %v1537_v26  ;;  %v1540_v31 = vadd.f32 %v3281_v29, %v4060_v15  ;;  %v1531_v32 = vpop.f32.mrb[27].mxu1 }
 0x1ef   :  { %v2876_v33 = vpack.c.bf16 %v1529_v28, %v1529_v28  ;;  %v1532_v34 = vadd.f32 %v4060_v15, %v1531_v32 }
 0x1f0   :  { %2482 = vst.msk [vmem:[%s4743_s5 + $0x68] sm:$0xf] %vm2455_vm2, %v2878_v30  ;;  %v2879_v35 = vpack.c.bf16 %v1540_v31, %v1540_v31 }
 0x1f1   :  { %2480 = vst.msk [vmem:[%s4743_s5 + $0x60] sm:$0xf] %vm2455_vm2, %v2876_v33  ;;  %v2877_v36 = vpack.c.bf16 %v1532_v34, %v1532_v34 }
 0x1f2   :  { %2483 = vst.msk [vmem:[%s4743_s5 + $0x6c] sm:$0xf] %vm2455_vm2, %v2879_v35 }
 0x1f3   :  { %2481 = vst.msk [vmem:[%s4743_s5 + $0x64] sm:$0xf] %vm2455_vm2, %v2877_v36  ;;  %v3284_v37 = vpop.f32.mrb[28].mxu1 }
 0x1f4   :  { %v1553_v38 = vadd.f32 %v3284_v37, %v4060_v15  ;;  %v1544_v39 = vpop.f32.mrb[29].mxu1 }
 0x1f5   :  { %v1545_v40 = vadd.f32 %v4060_v15, %v1544_v39  ;;  %v3285_v42 = vpop.f32.mrb[30].mxu1 }
 0x1f6   :  { %v2882_v44 = vpack.c.bf16 %v1553_v38, %v1553_v38  ;;  %v1556_v43 = vadd.f32 %v3285_v42, %v4060_v15  ;;  %v1547_v45 = vpop.f32.mrb[31].mxu1 }
 0x1f7   :  { %v2880_v46 = vpack.c.bf16 %v1545_v40, %v1545_v40  ;;  %v1548_v47 = vadd.f32 %v4060_v15, %v1547_v45 }
 0x1f8   :  { %2486 = vst.msk [vmem:[%s4743_s5 + $0x78] sm:$0xf] %vm2455_vm2, %v2882_v44  ;;  %v2883_v48 = vpack.c.bf16 %v1556_v43, %v1556_v43 }
 0x1f9   :  { %2484 = vst.msk [vmem:[%s4743_s5 + $0x70] sm:$0xf] %vm2455_vm2, %v2880_v46  ;;  %v2881_v49 = vpack.c.bf16 %v1548_v47, %v1548_v47 }
 0x1fa   :  { %2487 = vst.msk [vmem:[%s4743_s5 + $0x7c] sm:$0xf] %vm2455_vm2, %v2883_v48 }
 0x1fb   :  { %2485 = vst.msk [vmem:[%s4743_s5 + $0x74] sm:$0xf] %vm2455_vm2, %v2881_v49  ;;  %v3288_v50 = vpop.f32.mrb[32].mxu1 }
 0x1fc   :  { %v1569_v51 = vadd.f32 %v3288_v50, %v4060_v15  ;;  %v1560_v52 = vpop.f32.mrb[33].mxu1 }
 0x1fd   :  { %v1561_v53 = vadd.f32 %v4060_v15, %v1560_v52  ;;  %v3289_v54 = vpop.f32.mrb[34].mxu1 }
 0x1fe   :  { %v2886_v55 = vpack.c.bf16 %v1569_v51, %v1569_v51  ;;  %v1572_v56 = vadd.f32 %v3289_v54, %v4060_v15  ;;  %v1563_v57 = vpop.f32.mrb[35].mxu1 }
 0x1ff   :  { %v2884_v58 = vpack.c.bf16 %v1561_v53, %v1561_v53  ;;  %v1564_v59 = vadd.f32 %v4060_v15, %v1563_v57 }
 0x200   :  { %2490 = vst.msk [vmem:[%s4743_s5 + $0x88] sm:$0xf] %vm2455_vm2, %v2886_v55  ;;  %v2887_v60 = vpack.c.bf16 %v1572_v56, %v1572_v56 }
 0x201   :  { %2488 = vst.msk [vmem:[%s4743_s5 + $0x80] sm:$0xf] %vm2455_vm2, %v2884_v58  ;;  %v2885_v61 = vpack.c.bf16 %v1564_v59, %v1564_v59 }
 0x202   :  { %2491 = vst.msk [vmem:[%s4743_s5 + $0x8c] sm:$0xf] %vm2455_vm2, %v2887_v60 }
 0x203   :  { %2489 = vst.msk [vmem:[%s4743_s5 + $0x84] sm:$0xf] %vm2455_vm2, %v2885_v61  ;;  %v3292_v62 = vpop.f32.mrb[36].mxu1 }
 0x204   :  { %v1585_v63 = vadd.f32 %v3292_v62, %v4060_v15  ;;  %v1576_v0 = vpop.f32.mrb[37].mxu1 }
 0x205   :  { %v1577_v1 = vadd.f32 %v4060_v15, %v1576_v0  ;;  %v3293_v2 = vpop.f32.mrb[38].mxu1 }
 0x206   :  { %v2890_v41 = vpack.c.bf16 %v1585_v63, %v1585_v63  ;;  %v1588_v3 = vadd.f32 %v3293_v2, %v4060_v15  ;;  %v1579_v4 = vpop.f32.mrb[39].mxu1 }
 0x207   :  { %v2888_v5 = vpack.c.bf16 %v1577_v1, %v1577_v1  ;;  %v1580_v6 = vadd.f32 %v4060_v15, %v1579_v4 }
 0x208   :  { %2494 = vst.msk [vmem:[%s4743_s5 + $0x98] sm:$0xf] %vm2455_vm2, %v2890_v41  ;;  %v2891_v7 = vpack.c.bf16 %v1588_v3, %v1588_v3 }
 0x209   :  { %2492 = vst.msk [vmem:[%s4743_s5 + $0x90] sm:$0xf] %vm2455_vm2, %v2888_v5  ;;  %v2889_v8 = vpack.c.bf16 %v1580_v6, %v1580_v6 }
 0x20a   :  { %2495 = vst.msk [vmem:[%s4743_s5 + $0x9c] sm:$0xf] %vm2455_vm2, %v2891_v7 }
 0x20b   :  { %2493 = vst.msk [vmem:[%s4743_s5 + $0x94] sm:$0xf] %vm2455_vm2, %v2889_v8  ;;  %v3296_v9 = vpop.f32.mrb[40].mxu1 }
 0x20c   :  { %v1601_v10 = vadd.f32 %v3296_v9, %v4060_v15  ;;  %v1592_v11 = vpop.f32.mrb[41].mxu1 }
 0x20d   :  { %v1593_v12 = vadd.f32 %v4060_v15, %v1592_v11  ;;  %v3297_v13 = vpop.f32.mrb[42].mxu1 }
 0x20e   :  { %v2894_v14 = vpack.c.bf16 %v1601_v10, %v1601_v10  ;;  %v1604_v16 = vadd.f32 %v3297_v13, %v4060_v15  ;;  %v1595_v17 = vpop.f32.mrb[43].mxu1 }
 0x20f   :  { %v2892_v18 = vpack.c.bf16 %v1593_v12, %v1593_v12  ;;  %v1596_v19 = vadd.f32 %v4060_v15, %v1595_v17 }
 0x210   :  { %2498 = vst.msk [vmem:[%s4743_s5 + $0xa8] sm:$0xf] %vm2455_vm2, %v2894_v14  ;;  %v2895_v20 = vpack.c.bf16 %v1604_v16, %v1604_v16 }
 0x211   :  { %2496 = vst.msk [vmem:[%s4743_s5 + $0xa0] sm:$0xf] %vm2455_vm2, %v2892_v18  ;;  %v2893_v21 = vpack.c.bf16 %v1596_v19, %v1596_v19 }
 0x212   :  { %2499 = vst.msk [vmem:[%s4743_s5 + $0xac] sm:$0xf] %vm2455_vm2, %v2895_v20 }
 0x213   :  { %2497 = vst.msk [vmem:[%s4743_s5 + $0xa4] sm:$0xf] %vm2455_vm2, %v2893_v21  ;;  %v3300_v22 = vpop.f32.mrb[44].mxu1 }
 0x214   :  { %v1617_v23 = vadd.f32 %v3300_v22, %v4060_v15  ;;  %v1608_v24 = vpop.f32.mrb[45].mxu1 }
 0x215   :  { %v1609_v25 = vadd.f32 %v4060_v15, %v1608_v24  ;;  %v3301_v26 = vpop.f32.mrb[46].mxu1 }
 0x216   :  { %v2898_v27 = vpack.c.bf16 %v1617_v23, %v1617_v23  ;;  %v1620_v28 = vadd.f32 %v3301_v26, %v4060_v15  ;;  %v1611_v29 = vpop.f32.mrb[47].mxu1 }
 0x217   :  { %v2896_v30 = vpack.c.bf16 %v1609_v25, %v1609_v25  ;;  %v1612_v31 = vadd.f32 %v4060_v15, %v1611_v29 }
 0x218   :  { %2502 = vst.msk [vmem:[%s4743_s5 + $0xb8] sm:$0xf] %vm2455_vm2, %v2898_v27  ;;  %v2899_v32 = vpack.c.bf16 %v1620_v28, %v1620_v28 }
 0x219   :  { %2500 = vst.msk [vmem:[%s4743_s5 + $0xb0] sm:$0xf] %vm2455_vm2, %v2896_v30  ;;  %v2897_v33 = vpack.c.bf16 %v1612_v31, %v1612_v31 }
 0x21a   :  { %2503 = vst.msk [vmem:[%s4743_s5 + $0xbc] sm:$0xf] %vm2455_vm2, %v2899_v32 }
 0x21b   :  { %2501 = vst.msk [vmem:[%s4743_s5 + $0xb4] sm:$0xf] %vm2455_vm2, %v2897_v33  ;;  %v3304_v34 = vpop.f32.mrb[48].mxu1 }
 0x21c   :  { %v1633_v35 = vadd.f32 %v3304_v34, %v4060_v15  ;;  %v1624_v36 = vpop.f32.mrb[49].mxu1 }
 0x21d   :  { %v1625_v37 = vadd.f32 %v4060_v15, %v1624_v36  ;;  %v3305_v38 = vpop.f32.mrb[50].mxu1 }
 0x21e   :  { %v2902_v39 = vpack.c.bf16 %v1633_v35, %v1633_v35  ;;  %v1636_v40 = vadd.f32 %v3305_v38, %v4060_v15  ;;  %v1627_v42 = vpop.f32.mrb[51].mxu1 }
 0x21f   :  { %v2900_v44 = vpack.c.bf16 %v1625_v37, %v1625_v37  ;;  %v1628_v43 = vadd.f32 %v4060_v15, %v1627_v42 }
 0x220   :  { %2506 = vst.msk [vmem:[%s4743_s5 + $0xc8] sm:$0xf] %vm2455_vm2, %v2902_v39  ;;  %v2903_v45 = vpack.c.bf16 %v1636_v40, %v1636_v40 }
 0x221   :  { %2504 = vst.msk [vmem:[%s4743_s5 + $0xc0] sm:$0xf] %vm2455_vm2, %v2900_v44  ;;  %v2901_v46 = vpack.c.bf16 %v1628_v43, %v1628_v43 }
 0x222   :  { %2507 = vst.msk [vmem:[%s4743_s5 + $0xcc] sm:$0xf] %vm2455_vm2, %v2903_v45 }
 0x223   :  { %2505 = vst.msk [vmem:[%s4743_s5 + $0xc4] sm:$0xf] %vm2455_vm2, %v2901_v46  ;;  %v3308_v47 = vpop.f32.mrb[52].mxu1 }
 0x224   :  { %v1649_v48 = vadd.f32 %v3308_v47, %v4060_v15  ;;  %v1640_v49 = vpop.f32.mrb[53].mxu1 }
 0x225   :  { %v1641_v50 = vadd.f32 %v4060_v15, %v1640_v49  ;;  %v3309_v51 = vpop.f32.mrb[54].mxu1 }
 0x226   :  { %v2906_v52 = vpack.c.bf16 %v1649_v48, %v1649_v48  ;;  %v1652_v53 = vadd.f32 %v3309_v51, %v4060_v15  ;;  %v1643_v54 = vpop.f32.mrb[55].mxu1 }
 0x227   :  { %v2904_v55 = vpack.c.bf16 %v1641_v50, %v1641_v50  ;;  %v1644_v56 = vadd.f32 %v4060_v15, %v1643_v54 }
 0x228   :  { %2510 = vst.msk [vmem:[%s4743_s5 + $0xd8] sm:$0xf] %vm2455_vm2, %v2906_v52  ;;  %v2907_v57 = vpack.c.bf16 %v1652_v53, %v1652_v53 }
 0x229   :  { %2508 = vst.msk [vmem:[%s4743_s5 + $0xd0] sm:$0xf] %vm2455_vm2, %v2904_v55  ;;  %v2905_v58 = vpack.c.bf16 %v1644_v56, %v1644_v56 }
 0x22a   :  { %2511 = vst.msk [vmem:[%s4743_s5 + $0xdc] sm:$0xf] %vm2455_vm2, %v2907_v57 }
 0x22b   :  { %2509 = vst.msk [vmem:[%s4743_s5 + $0xd4] sm:$0xf] %vm2455_vm2, %v2905_v58  ;;  %v3312_v59 = vpop.f32.mrb[56].mxu1 }
 0x22c   :  { %v1665_v60 = vadd.f32 %v3312_v59, %v4060_v15  ;;  %v1656_v61 = vpop.f32.mrb[57].mxu1 }
 0x22d   :  { %v1657_v62 = vadd.f32 %v4060_v15, %v1656_v61  ;;  %v3313_v63 = vpop.f32.mrb[58].mxu1 }
 0x22e   :  { %v2910_v0 = vpack.c.bf16 %v1665_v60, %v1665_v60  ;;  %v1668_v1 = vadd.f32 %v3313_v63, %v4060_v15  ;;  %v1659_v2 = vpop.f32.mrb[59].mxu1 }
 0x22f   :  { %v2908_v41 = vpack.c.bf16 %v1657_v62, %v1657_v62  ;;  %v1660_v3 = vadd.f32 %v4060_v15, %v1659_v2 }
 0x230   :  { %2514 = vst.msk [vmem:[%s4743_s5 + $0xe8] sm:$0xf] %vm2455_vm2, %v2910_v0  ;;  %v2911_v4 = vpack.c.bf16 %v1668_v1, %v1668_v1 }
 0x231   :  { %2512 = vst.msk [vmem:[%s4743_s5 + $0xe0] sm:$0xf] %vm2455_vm2, %v2908_v41  ;;  %v2909_v5 = vpack.c.bf16 %v1660_v3, %v1660_v3 }
 0x232   :  { %2515 = vst.msk [vmem:[%s4743_s5 + $0xec] sm:$0xf] %vm2455_vm2, %v2911_v4 }
 0x233   :  { %2513 = vst.msk [vmem:[%s4743_s5 + $0xe4] sm:$0xf] %vm2455_vm2, %v2909_v5  ;;  %v3316_v6 = vpop.f32.mrb[60].mxu1 }
 0x234   :  { %v1681_v7 = vadd.f32 %v3316_v6, %v4060_v15  ;;  %v1672_v8 = vpop.f32.mrb[61].mxu1 }
 0x235   :  { %v1673_v9 = vadd.f32 %v4060_v15, %v1672_v8  ;;  %v3317_v10 = vpop.f32.mrb[62].mxu1 }
 0x236   :  { %v2914_v11 = vpack.c.bf16 %v1681_v7, %v1681_v7  ;;  %v1684_v12 = vadd.f32 %v3317_v10, %v4060_v15  ;;  %v1675_v13 = vpop.f32.mrb[63].mxu1 }
 0x237   :  { %v2912_v14 = vpack.c.bf16 %v1673_v9, %v1673_v9  ;;  %v1676_v16 = vadd.f32 %v4060_v15, %v1675_v13 }
 0x238   :  { %2518 = vst.msk [vmem:[%s4743_s5 + $0xf8] sm:$0xf] %vm2455_vm2, %v2914_v11  ;;  %v2915_v17 = vpack.c.bf16 %v1684_v12, %v1684_v12 }
 0x239   :  { %2516 = vst.msk [vmem:[%s4743_s5 + $0xf0] sm:$0xf] %vm2455_vm2, %v2912_v14  ;;  %v2913_v18 = vpack.c.bf16 %v1676_v16, %v1676_v16 }
 0x23a   :  { %2519 = vst.msk [vmem:[%s4743_s5 + $0xfc] sm:$0xf] %vm2455_vm2, %v2915_v17 }
 0x23b   :  { %2517 = vst.msk [vmem:[%s4743_s5 + $0xf4] sm:$0xf] %vm2455_vm2, %v2913_v18  ;;  %v3320_v19 = vpop.f32.mrb[64].mxu1 }
 0x23c   :  { %v1697_v20 = vadd.f32 %v3320_v19, %v4060_v15  ;;  %v1688_v21 = vpop.f32.mrb[65].mxu1 }
 0x23d   :  { %v1689_v22 = vadd.f32 %v4060_v15, %v1688_v21  ;;  %v3321_v23 = vpop.f32.mrb[66].mxu1 }
 0x23e   :  { %v2918_v24 = vpack.c.bf16 %v1697_v20, %v1697_v20  ;;  %v1700_v25 = vadd.f32 %v3321_v23, %v4060_v15  ;;  %v1691_v26 = vpop.f32.mrb[67].mxu1 }
 0x23f   :  { %v2916_v27 = vpack.c.bf16 %v1689_v22, %v1689_v22  ;;  %v1692_v28 = vadd.f32 %v4060_v15, %v1691_v26 }
 0x240   :  { %2522 = vst.msk [vmem:[%s4743_s5 + $0x108] sm:$0xf] %vm2455_vm2, %v2918_v24  ;;  %v2919_v29 = vpack.c.bf16 %v1700_v25, %v1700_v25 }
 0x241   :  { %2520 = vst.msk [vmem:[%s4743_s5 + $0x100] sm:$0xf] %vm2455_vm2, %v2916_v27  ;;  %v2917_v30 = vpack.c.bf16 %v1692_v28, %v1692_v28 }
 0x242   :  { %2523 = vst.msk [vmem:[%s4743_s5 + $0x10c] sm:$0xf] %vm2455_vm2, %v2919_v29 }
 0x243   :  { %2521 = vst.msk [vmem:[%s4743_s5 + $0x104] sm:$0xf] %vm2455_vm2, %v2917_v30  ;;  %v3324_v31 = vpop.f32.mrb[68].mxu1 }
 0x244   :  { %v1713_v32 = vadd.f32 %v3324_v31, %v4060_v15  ;;  %v1704_v33 = vpop.f32.mrb[69].mxu1 }
 0x245   :  { %v1705_v34 = vadd.f32 %v4060_v15, %v1704_v33  ;;  %v3325_v35 = vpop.f32.mrb[70].mxu1 }
 0x246   :  { %v2922_v36 = vpack.c.bf16 %v1713_v32, %v1713_v32  ;;  %v1716_v37 = vadd.f32 %v3325_v35, %v4060_v15  ;;  %v1707_v38 = vpop.f32.mrb[71].mxu1 }
 0x247   :  { %v2920_v39 = vpack.c.bf16 %v1705_v34, %v1705_v34  ;;  %v1708_v40 = vadd.f32 %v4060_v15, %v1707_v38 }
 0x248   :  { %2526 = vst.msk [vmem:[%s4743_s5 + $0x118] sm:$0xf] %vm2455_vm2, %v2922_v36  ;;  %v2923_v42 = vpack.c.bf16 %v1716_v37, %v1716_v37 }
 0x249   :  { %2524 = vst.msk [vmem:[%s4743_s5 + $0x110] sm:$0xf] %vm2455_vm2, %v2920_v39  ;;  %v2921_v44 = vpack.c.bf16 %v1708_v40, %v1708_v40 }
 0x24a   :  { %2527 = vst.msk [vmem:[%s4743_s5 + $0x11c] sm:$0xf] %vm2455_vm2, %v2923_v42 }
 0x24b   :  { %2525 = vst.msk [vmem:[%s4743_s5 + $0x114] sm:$0xf] %vm2455_vm2, %v2921_v44  ;;  %v3328_v43 = vpop.f32.mrb[72].mxu1 }
 0x24c   :  { %v1729_v45 = vadd.f32 %v3328_v43, %v4060_v15  ;;  %v1720_v46 = vpop.f32.mrb[73].mxu1 }
 0x24d   :  { %v1721_v47 = vadd.f32 %v4060_v15, %v1720_v46  ;;  %v3329_v48 = vpop.f32.mrb[74].mxu1 }
 0x24e   :  { %v2926_v49 = vpack.c.bf16 %v1729_v45, %v1729_v45  ;;  %v1732_v50 = vadd.f32 %v3329_v48, %v4060_v15  ;;  %v1723_v51 = vpop.f32.mrb[75].mxu1 }
 0x24f   :  { %v2924_v52 = vpack.c.bf16 %v1721_v47, %v1721_v47  ;;  %v1724_v53 = vadd.f32 %v4060_v15, %v1723_v51 }
 0x250   :  { %2530 = vst.msk [vmem:[%s4743_s5 + $0x128] sm:$0xf] %vm2455_vm2, %v2926_v49  ;;  %v2927_v54 = vpack.c.bf16 %v1732_v50, %v1732_v50 }
 0x251   :  { %2528 = vst.msk [vmem:[%s4743_s5 + $0x120] sm:$0xf] %vm2455_vm2, %v2924_v52  ;;  %v2925_v55 = vpack.c.bf16 %v1724_v53, %v1724_v53 }
 0x252   :  { %2531 = vst.msk [vmem:[%s4743_s5 + $0x12c] sm:$0xf] %vm2455_vm2, %v2927_v54 }
 0x253   :  { %2529 = vst.msk [vmem:[%s4743_s5 + $0x124] sm:$0xf] %vm2455_vm2, %v2925_v55  ;;  %v3332_v56 = vpop.f32.mrb[76].mxu1 }
 0x254   :  { %v1745_v57 = vadd.f32 %v3332_v56, %v4060_v15  ;;  %v1736_v58 = vpop.f32.mrb[77].mxu1 }
 0x255   :  { %v1737_v59 = vadd.f32 %v4060_v15, %v1736_v58  ;;  %v3333_v60 = vpop.f32.mrb[78].mxu1 }
 0x256   :  { %v2930_v61 = vpack.c.bf16 %v1745_v57, %v1745_v57  ;;  %v1748_v62 = vadd.f32 %v3333_v60, %v4060_v15  ;;  %v1739_v63 = vpop.f32.mrb[79].mxu1 }
 0x257   :  { %v2928_v0 = vpack.c.bf16 %v1737_v59, %v1737_v59  ;;  %v1740_v1 = vadd.f32 %v4060_v15, %v1739_v63 }
 0x258   :  { %2534 = vst.msk [vmem:[%s4743_s5 + $0x138] sm:$0xf] %vm2455_vm2, %v2930_v61  ;;  %v2931_v2 = vpack.c.bf16 %v1748_v62, %v1748_v62 }
 0x259   :  { %2532 = vst.msk [vmem:[%s4743_s5 + $0x130] sm:$0xf] %vm2455_vm2, %v2928_v0  ;;  %v2929_v41 = vpack.c.bf16 %v1740_v1, %v1740_v1 }
 0x25a   :  { %2535 = vst.msk [vmem:[%s4743_s5 + $0x13c] sm:$0xf] %vm2455_vm2, %v2931_v2 }
 0x25b   :  { %2533 = vst.msk [vmem:[%s4743_s5 + $0x134] sm:$0xf] %vm2455_vm2, %v2929_v41  ;;  %v3336_v3 = vpop.f32.mrb[80].mxu1 }
 0x25c   :  { %v1761_v4 = vadd.f32 %v3336_v3, %v4060_v15  ;;  %v1752_v5 = vpop.f32.mrb[81].mxu1 }
 0x25d   :  { %v1753_v6 = vadd.f32 %v4060_v15, %v1752_v5  ;;  %v3337_v7 = vpop.f32.mrb[82].mxu1 }
 0x25e   :  { %v2934_v8 = vpack.c.bf16 %v1761_v4, %v1761_v4  ;;  %v1764_v9 = vadd.f32 %v3337_v7, %v4060_v15  ;;  %v1755_v10 = vpop.f32.mrb[83].mxu1 }
 0x25f   :  { %v2932_v11 = vpack.c.bf16 %v1753_v6, %v1753_v6  ;;  %v1756_v12 = vadd.f32 %v4060_v15, %v1755_v10 }
 0x260   :  { %2538 = vst.msk [vmem:[%s4743_s5 + $0x148] sm:$0xf] %vm2455_vm2, %v2934_v8  ;;  %v2935_v13 = vpack.c.bf16 %v1764_v9, %v1764_v9 }
 0x261   :  { %2536 = vst.msk [vmem:[%s4743_s5 + $0x140] sm:$0xf] %vm2455_vm2, %v2932_v11  ;;  %v2933_v14 = vpack.c.bf16 %v1756_v12, %v1756_v12 }
 0x262   :  { %2539 = vst.msk [vmem:[%s4743_s5 + $0x14c] sm:$0xf] %vm2455_vm2, %v2935_v13 }
 0x263   :  { %2537 = vst.msk [vmem:[%s4743_s5 + $0x144] sm:$0xf] %vm2455_vm2, %v2933_v14  ;;  %v3340_v16 = vpop.f32.mrb[84].mxu1 }
 0x264   :  { %v1777_v17 = vadd.f32 %v3340_v16, %v4060_v15  ;;  %v1768_v18 = vpop.f32.mrb[85].mxu1 }
 0x265   :  { %v1769_v19 = vadd.f32 %v4060_v15, %v1768_v18  ;;  %v3341_v20 = vpop.f32.mrb[86].mxu1 }
 0x266   :  { %v2938_v21 = vpack.c.bf16 %v1777_v17, %v1777_v17  ;;  %v1780_v22 = vadd.f32 %v3341_v20, %v4060_v15  ;;  %v1771_v23 = vpop.f32.mrb[87].mxu1 }
 0x267   :  { %v2936_v24 = vpack.c.bf16 %v1769_v19, %v1769_v19  ;;  %v1772_v25 = vadd.f32 %v4060_v15, %v1771_v23 }
 0x268   :  { %2542 = vst.msk [vmem:[%s4743_s5 + $0x158] sm:$0xf] %vm2455_vm2, %v2938_v21  ;;  %v2939_v26 = vpack.c.bf16 %v1780_v22, %v1780_v22 }
 0x269   :  { %2540 = vst.msk [vmem:[%s4743_s5 + $0x150] sm:$0xf] %vm2455_vm2, %v2936_v24  ;;  %v2937_v27 = vpack.c.bf16 %v1772_v25, %v1772_v25 }
 0x26a   :  { %2543 = vst.msk [vmem:[%s4743_s5 + $0x15c] sm:$0xf] %vm2455_vm2, %v2939_v26 }
 0x26b   :  { %2541 = vst.msk [vmem:[%s4743_s5 + $0x154] sm:$0xf] %vm2455_vm2, %v2937_v27  ;;  %v3344_v28 = vpop.f32.mrb[88].mxu1 }
 0x26c   :  { %v1793_v29 = vadd.f32 %v3344_v28, %v4060_v15  ;;  %v1784_v30 = vpop.f32.mrb[89].mxu1 }
 0x26d   :  { %v1785_v31 = vadd.f32 %v4060_v15, %v1784_v30  ;;  %v3345_v32 = vpop.f32.mrb[90].mxu1 }
 0x26e   :  { %v2942_v33 = vpack.c.bf16 %v1793_v29, %v1793_v29  ;;  %v1796_v34 = vadd.f32 %v3345_v32, %v4060_v15  ;;  %v1787_v35 = vpop.f32.mrb[91].mxu1 }
 0x26f   :  { %v2940_v36 = vpack.c.bf16 %v1785_v31, %v1785_v31  ;;  %v1788_v37 = vadd.f32 %v4060_v15, %v1787_v35  ;;  %v4638_v31 = vld [vmem:[%s4742_s4] ss:$0 sm:$0xff] }
 0x270   :  { %2546 = vst.msk [vmem:[%s4743_s5 + $0x168] sm:$0xf] %vm2455_vm2, %v2942_v33  ;;  %v2943_v38 = vpack.c.bf16 %v1796_v34, %v1796_v34 }
 0x271   :  { %2544 = vst.msk [vmem:[%s4743_s5 + $0x160] sm:$0xf] %vm2455_vm2, %v2940_v36  ;;  %v2941_v39 = vpack.c.bf16 %v1788_v37, %v1788_v37 }
 0x272   :  { %2547 = vst.msk [vmem:[%s4743_s5 + $0x16c] sm:$0xf] %vm2455_vm2, %v2943_v38 }
 0x273   :  { %2545 = vst.msk [vmem:[%s4743_s5 + $0x164] sm:$0xf] %vm2455_vm2, %v2941_v39  ;;  %v3348_v40 = vpop.f32.mrb[92].mxu1 }
 0x274   :  { %v1809_v42 = vadd.f32 %v3348_v40, %v4060_v15  ;;  %v1800_v44 = vpop.f32.mrb[93].mxu1 }
 0x275   :  { %v1801_v43 = vadd.f32 %v4060_v15, %v1800_v44  ;;  %v3349_v45 = vpop.f32.mrb[94].mxu1 }
 0x276   :  { %v2946_v46 = vpack.c.bf16 %v1809_v42, %v1809_v42  ;;  %v1812_v47 = vadd.f32 %v3349_v45, %v4060_v15  ;;  %v1803_v48 = vpop.f32.mrb[95].mxu1 }
 0x277   :  { %v2944_v49 = vpack.c.bf16 %v1801_v43, %v1801_v43  ;;  %v1804_v50 = vadd.f32 %v4060_v15, %v1803_v48 }
 0x278   :  { %2550 = vst.msk [vmem:[%s4743_s5 + $0x178] sm:$0xf] %vm2455_vm2, %v2946_v46  ;;  %v2947_v51 = vpack.c.bf16 %v1812_v47, %v1812_v47 }
 0x279   :  { %2548 = vst.msk [vmem:[%s4743_s5 + $0x170] sm:$0xf] %vm2455_vm2, %v2944_v49  ;;  %v2945_v52 = vpack.c.bf16 %v1804_v50, %v1804_v50 }
 0x27a   :  { %2551 = vst.msk [vmem:[%s4743_s5 + $0x17c] sm:$0xf] %vm2455_vm2, %v2947_v51 }
 0x27b   :  { %2549 = vst.msk [vmem:[%s4743_s5 + $0x174] sm:$0xf] %vm2455_vm2, %v2945_v52  ;;  %v3352_v53 = vpop.f32.mrb[96].mxu1 }
 0x27c   :  { %v1825_v54 = vadd.f32 %v3352_v53, %v4060_v15  ;;  %v1816_v55 = vpop.f32.mrb[97].mxu1 }
 0x27d   :  { %v1817_v56 = vadd.f32 %v4060_v15, %v1816_v55  ;;  %v3353_v57 = vpop.f32.mrb[98].mxu1 }
 0x27e   :  { %v2950_v58 = vpack.c.bf16 %v1825_v54, %v1825_v54  ;;  %v1828_v59 = vadd.f32 %v3353_v57, %v4060_v15  ;;  %v1819_v60 = vpop.f32.mrb[99].mxu1 }
 0x27f   :  { %v2948_v61 = vpack.c.bf16 %v1817_v56, %v1817_v56  ;;  %v1820_v62 = vadd.f32 %v4060_v15, %v1819_v60 }
 0x280   :  { %2554 = vst.msk [vmem:[%s4743_s5 + $0x188] sm:$0xf] %vm2455_vm2, %v2950_v58  ;;  %v2951_v63 = vpack.c.bf16 %v1828_v59, %v1828_v59 }
 0x281   :  { %2552 = vst.msk [vmem:[%s4743_s5 + $0x180] sm:$0xf] %vm2455_vm2, %v2948_v61  ;;  %v2949_v0 = vpack.c.bf16 %v1820_v62, %v1820_v62 }
 0x282   :  { %2555 = vst.msk [vmem:[%s4743_s5 + $0x18c] sm:$0xf] %vm2455_vm2, %v2951_v63 }
 0x283   :  { %2553 = vst.msk [vmem:[%s4743_s5 + $0x184] sm:$0xf] %vm2455_vm2, %v2949_v0  ;;  %v3356_v1 = vpop.f32.mrb[100].mxu1 }
 0x284   :  { %v1841_v2 = vadd.f32 %v3356_v1, %v4060_v15  ;;  %v1832_v41 = vpop.f32.mrb[101].mxu1 }
 0x285   :  { %v1833_v3 = vadd.f32 %v4060_v15, %v1832_v41  ;;  %v3357_v4 = vpop.f32.mrb[102].mxu1 }
 0x286   :  { %v2954_v5 = vpack.c.bf16 %v1841_v2, %v1841_v2  ;;  %v1844_v6 = vadd.f32 %v3357_v4, %v4060_v15  ;;  %v1835_v7 = vpop.f32.mrb[103].mxu1 }
 0x287   :  { %v2952_v8 = vpack.c.bf16 %v1833_v3, %v1833_v3  ;;  %v1836_v9 = vadd.f32 %v4060_v15, %v1835_v7 }
 0x288   :  { %2558 = vst.msk [vmem:[%s4743_s5 + $0x198] sm:$0xf] %vm2455_vm2, %v2954_v5  ;;  %v2955_v10 = vpack.c.bf16 %v1844_v6, %v1844_v6 }
 0x289   :  { %2556 = vst.msk [vmem:[%s4743_s5 + $0x190] sm:$0xf] %vm2455_vm2, %v2952_v8  ;;  %v2953_v11 = vpack.c.bf16 %v1836_v9, %v1836_v9 }
 0x28a   :  { %2559 = vst.msk [vmem:[%s4743_s5 + $0x19c] sm:$0xf] %vm2455_vm2, %v2955_v10 }
 0x28b   :  { %2557 = vst.msk [vmem:[%s4743_s5 + $0x194] sm:$0xf] %vm2455_vm2, %v2953_v11  ;;  %v3360_v12 = vpop.f32.mrb[104].mxu1 }
 0x28c   :  { %v1857_v13 = vadd.f32 %v3360_v12, %v4060_v15  ;;  %v1848_v14 = vpop.f32.mrb[105].mxu1 }
 0x28d   :  { %v1849_v16 = vadd.f32 %v4060_v15, %v1848_v14  ;;  %v3361_v17 = vpop.f32.mrb[106].mxu1 }
 0x28e   :  { %v2958_v18 = vpack.c.bf16 %v1857_v13, %v1857_v13  ;;  %v1860_v19 = vadd.f32 %v3361_v17, %v4060_v15  ;;  %v1851_v20 = vpop.f32.mrb[107].mxu1 }
 0x28f   :  { %v2956_v21 = vpack.c.bf16 %v1849_v16, %v1849_v16  ;;  %v1852_v22 = vadd.f32 %v4060_v15, %v1851_v20 }
 0x290   :  { %2562 = vst.msk [vmem:[%s4743_s5 + $0x1a8] sm:$0xf] %vm2455_vm2, %v2958_v18  ;;  %v2959_v23 = vpack.c.bf16 %v1860_v19, %v1860_v19 }
 0x291   :  { %2560 = vst.msk [vmem:[%s4743_s5 + $0x1a0] sm:$0xf] %vm2455_vm2, %v2956_v21  ;;  %v2957_v24 = vpack.c.bf16 %v1852_v22, %v1852_v22 }
 0x292   :  { %2563 = vst.msk [vmem:[%s4743_s5 + $0x1ac] sm:$0xf] %vm2455_vm2, %v2959_v23 }
 0x293   :  { %2561 = vst.msk [vmem:[%s4743_s5 + $0x1a4] sm:$0xf] %vm2455_vm2, %v2957_v24  ;;  %v3364_v25 = vpop.f32.mrb[108].mxu1 }
 0x294   :  { %v1873_v26 = vadd.f32 %v3364_v25, %v4060_v15  ;;  %v1864_v27 = vpop.f32.mrb[109].mxu1 }
 0x295   :  { %v1865_v28 = vadd.f32 %v4060_v15, %v1864_v27  ;;  %v3365_v29 = vpop.f32.mrb[110].mxu1 }
 0x296   :  { %v2962_v30 = vpack.c.bf16 %v1873_v26, %v1873_v26  ;;  %v1876_v32 = vadd.f32 %v4638_v31, %v3365_v29  ;;  %v1867_v33 = vpop.f32.mrb[111].mxu1 }
 0x297   :  { %v2960_v34 = vpack.c.bf16 %v1865_v28, %v1865_v28  ;;  %v1868_v35 = vadd.f32 %v4638_v31, %v1867_v33 }
 0x298   :  { %2566 = vst.msk [vmem:[%s4743_s5 + $0x1b8] sm:$0xf] %vm2455_vm2, %v2962_v30  ;;  %v2963_v36 = vpack.c.bf16 %v1876_v32, %v1876_v32 }
 0x299   :  { %2564 = vst.msk [vmem:[%s4743_s5 + $0x1b0] sm:$0xf] %vm2455_vm2, %v2960_v34  ;;  %v2961_v15 = vpack.c.bf16 %v1868_v35, %v1868_v35 }
 0x29a   :  { %2567 = vst.msk [vmem:[%s4743_s5 + $0x1bc] sm:$0xf] %vm2455_vm2, %v2963_v36 }
 0x29b   :  { %2565 = vst.msk [vmem:[%s4743_s5 + $0x1b4] sm:$0xf] %vm2455_vm2, %v2961_v15  ;;  %v3368_v37 = vpop.f32.mrb[112].mxu1 }
 0x29c   :  { %v1889_v38 = vadd.f32 %v4638_v31, %v3368_v37  ;;  %v1880_v39 = vpop.f32.mrb[113].mxu1 }
 0x29d   :  { %v1881_v40 = vadd.f32 %v4638_v31, %v1880_v39  ;;  %v3369_v42 = vpop.f32.mrb[114].mxu1 }
 0x29e   :  { %v2966_v44 = vpack.c.bf16 %v1889_v38, %v1889_v38  ;;  %v1892_v43 = vadd.f32 %v4638_v31, %v3369_v42  ;;  %v1883_v45 = vpop.f32.mrb[115].mxu1 }
 0x29f   :  { %v2964_v46 = vpack.c.bf16 %v1881_v40, %v1881_v40  ;;  %v1884_v47 = vadd.f32 %v4638_v31, %v1883_v45 }
 0x2a0   :  { %2570 = vst.msk [vmem:[%s4743_s5 + $0x1c8] sm:$0xf] %vm2455_vm2, %v2966_v44  ;;  %v2967_v48 = vpack.c.bf16 %v1892_v43, %v1892_v43 }
 0x2a1   :  { %2568 = vst.msk [vmem:[%s4743_s5 + $0x1c0] sm:$0xf] %vm2455_vm2, %v2964_v46  ;;  %v2965_v49 = vpack.c.bf16 %v1884_v47, %v1884_v47 }
 0x2a2   :  { %2571 = vst.msk [vmem:[%s4743_s5 + $0x1cc] sm:$0xf] %vm2455_vm2, %v2967_v48 }
 0x2a3   :  { %2569 = vst.msk [vmem:[%s4743_s5 + $0x1c4] sm:$0xf] %vm2455_vm2, %v2965_v49  ;;  %v3372_v50 = vpop.f32.mrb[116].mxu1 }
 0x2a4   :  { %v1905_v51 = vadd.f32 %v4638_v31, %v3372_v50  ;;  %v1896_v52 = vpop.f32.mrb[117].mxu1 }
 0x2a5   :  { %v1897_v53 = vadd.f32 %v4638_v31, %v1896_v52  ;;  %v3373_v54 = vpop.f32.mrb[118].mxu1 }
 0x2a6   :  { %v2970_v55 = vpack.c.bf16 %v1905_v51, %v1905_v51  ;;  %v1908_v56 = vadd.f32 %v4638_v31, %v3373_v54  ;;  %v1899_v57 = vpop.f32.mrb[119].mxu1 }
 0x2a7   :  { %v2968_v58 = vpack.c.bf16 %v1897_v53, %v1897_v53  ;;  %v1900_v59 = vadd.f32 %v4638_v31, %v1899_v57 }
 0x2a8   :  { %2574 = vst.msk [vmem:[%s4743_s5 + $0x1d8] sm:$0xf] %vm2455_vm2, %v2970_v55  ;;  %v2971_v60 = vpack.c.bf16 %v1908_v56, %v1908_v56 }
 0x2a9   :  { %2572 = vst.msk [vmem:[%s4743_s5 + $0x1d0] sm:$0xf] %vm2455_vm2, %v2968_v58  ;;  %v2969_v61 = vpack.c.bf16 %v1900_v59, %v1900_v59 }
 0x2aa   :  { %2575 = vst.msk [vmem:[%s4743_s5 + $0x1dc] sm:$0xf] %vm2455_vm2, %v2971_v60 }
 0x2ab   :  { %2573 = vst.msk [vmem:[%s4743_s5 + $0x1d4] sm:$0xf] %vm2455_vm2, %v2969_v61  ;;  %v3376_v62 = vpop.f32.mrb[120].mxu1 }
 0x2ac   :  { %v1921_v63 = vadd.f32 %v4638_v31, %v3376_v62  ;;  %v1912_v0 = vpop.f32.mrb[121].mxu1 }
 0x2ad   :  { %v1913_v1 = vadd.f32 %v4638_v31, %v1912_v0  ;;  %v3377_v2 = vpop.f32.mrb[122].mxu1 }
 0x2ae   :  { %v2974_v41 = vpack.c.bf16 %v1921_v63, %v1921_v63  ;;  %v1924_v3 = vadd.f32 %v4638_v31, %v3377_v2  ;;  %v1915_v4 = vpop.f32.mrb[123].mxu1 }
 0x2af   :  { %v2972_v5 = vpack.c.bf16 %v1913_v1, %v1913_v1  ;;  %v1916_v6 = vadd.f32 %v4638_v31, %v1915_v4 }
 0x2b0   :  { %2578 = vst.msk [vmem:[%s4743_s5 + $0x1e8] sm:$0xf] %vm2455_vm2, %v2974_v41  ;;  %v2975_v7 = vpack.c.bf16 %v1924_v3, %v1924_v3 }
 0x2b1   :  { %2576 = vst.msk [vmem:[%s4743_s5 + $0x1e0] sm:$0xf] %vm2455_vm2, %v2972_v5  ;;  %v2973_v8 = vpack.c.bf16 %v1916_v6, %v1916_v6 }
 0x2b2   :  { %2579 = vst.msk [vmem:[%s4743_s5 + $0x1ec] sm:$0xf] %vm2455_vm2, %v2975_v7 }
 0x2b3   :  { %2577 = vst.msk [vmem:[%s4743_s5 + $0x1e4] sm:$0xf] %vm2455_vm2, %v2973_v8  ;;  %v3380_v9 = vpop.f32.mrb[124].mxu1 }
 0x2b4   :  { %v1937_v10 = vadd.f32 %v4638_v31, %v3380_v9  ;;  %v1928_v11 = vpop.f32.mrb[125].mxu1 }
 0x2b5   :  { %v1929_v12 = vadd.f32 %v4638_v31, %v1928_v11  ;;  %v3381_v13 = vpop.f32.mrb[126].mxu1 }
 0x2b6   :  { %v2978_v14 = vpack.c.bf16 %v1937_v10, %v1937_v10  ;;  %v1940_v16 = vadd.f32 %v4638_v31, %v3381_v13  ;;  %v1931_v17 = vpop.f32.mrb[127].mxu1 }
 0x2b7   :  { %v2976_v18 = vpack.c.bf16 %v1929_v12, %v1929_v12  ;;  %v1932_v19 = vadd.f32 %v4638_v31, %v1931_v17 }
 0x2b8   :  { %2582 = vst.msk [vmem:[%s4743_s5 + $0x1f8] sm:$0xf] %vm2455_vm2, %v2978_v14  ;;  %v2979_v20 = vpack.c.bf16 %v1940_v16, %v1940_v16 }
 0x2b9   :  { %2580 = vst.msk [vmem:[%s4743_s5 + $0x1f0] sm:$0xf] %vm2455_vm2, %v2976_v18  ;;  %v2977_v21 = vpack.c.bf16 %v1932_v19, %v1932_v19 }
 0x2ba   :  { %2583 = vst.msk [vmem:[%s4743_s5 + $0x1fc] sm:$0xf] %vm2455_vm2, %v2979_v20 }
 0x2bb   :  { %2581 = vst.msk [vmem:[%s4743_s5 + $0x1f4] sm:$0xf] %vm2455_vm2, %v2977_v21 }

</bundles_post_ra>
